<compile_context>
chip_gen: v5e
topology: v5e:2x2
jax: 0.10.0
libtpu: 0.0.40
codegen_flags: <defaults>
</compile_context>

<pallas_src>
import functools
import math

import jax
import jax.numpy as jnp
from jax.experimental import pallas as pl
from jax.experimental.pallas import tpu as pltpu

D_IN = 768      # hidden size of the host model
D_MID = 128     # adapter bottleneck


def _gelu(x, approximate):
    if approximate:
        # tanh approximation -> EUP (separate VLIW slot), far less VALU work.
        return jax.nn.gelu(x, approximate=True)
    # torch.nn.GELU() default (approximate='none'): 0.5*x*(1+erf(x/sqrt(2)))
    return 0.5 * x * (1.0 + jax.lax.erf(x * (1.0 / math.sqrt(2.0))))


def _adapter_kernel(x_ref, w1_ref, b1_ref, w2g_ref, b2_ref, g2_ref, o_ref,
                    *, approximate_gelu):
    """Fused: fc1 -> GELU -> (gate1 folded into W2) fc2 -> GELU -> gate2 -> residual."""
    x = x_ref[...]                                            # (tm, 768) f32

    # fc1: bf16 operands, f32 accumulate on the MXU.
    h = jnp.dot(x.astype(jnp.bfloat16), w1_ref[...],
                preferred_element_type=jnp.float32)           # (tm, 128) f32
    h = _gelu(h + b1_ref[...], approximate_gelu)

    # fc2 (gate1 already folded into the bf16 weight) + GELU + gate2.
    h2 = jnp.dot(h.astype(jnp.bfloat16), w2g_ref[...],
                 preferred_element_type=jnp.float32)          # (tm, 768) f32
    h2 = _gelu(h2 + b2_ref[...], approximate_gelu) * g2_ref[...]

    # residual
    o_ref[...] = x + h2


def _round_up(v, mult):
    return -(-v // mult) * mult


def _cdiv(a, b):
    return -(-a // b)


def _pick_tm(m):
    """One tile for m <= 1024; otherwise balanced ~1024-row tiles (8-aligned)."""
    m8 = _round_up(m, 8)
    steps = _cdiv(m8, 1024)
    return _round_up(_cdiv(m8, steps), 8)


def adapter_forward(x, params, task, s, *, tm=None, approximate_gelu=False):
    """x: (batch, seq, 768) float32 -> (batch, seq, 768) float32."""
    batch, seq, d = x.shape
    assert d == D_IN
    m = batch * seq
    x2d = x.reshape(m, d)

    if tm is None:
        tm = _pick_tm(m)
    tm = _round_up(tm, 8)
    grid_m = pl.cdiv(m, tm)   # ragged last block handled by Pallas masked stores

    # ---- plain-JAX glue: gate + weight prep, computed once (not per tile) ----
    s_f = jnp.float32(s)
    g1 = jax.nn.sigmoid(s_f * params["efc1"][task]).reshape(D_MID, 1)   # (128, 1)
    g2 = jax.nn.sigmoid(s_f * params["efc2"][task]).reshape(1, D_IN)    # (1, 768)

    # PyTorch Linear: y = x @ W^T + b  ->  pre-transpose; cast weights to bf16 for MXU.
    w1t = params["fc1_w"].T.astype(jnp.bfloat16)                # (768, 128) bf16
    w2g = (g1 * params["fc2_w"].T).astype(jnp.bfloat16)         # (128, 768) bf16, gate1 folded
    b1 = params["fc1_b"].reshape(1, D_MID).astype(jnp.float32)  # (1, 128)
    b2 = params["fc2_b"].reshape(1, D_IN).astype(jnp.float32)   # (1, 768)

    kernel = functools.partial(_adapter_kernel, approximate_gelu=approximate_gelu)

    out2d = pl.pallas_call(
        kernel,
        out_shape=jax.ShapeDtypeStruct((m, D_IN), jnp.float32),
        grid_spec=pltpu.PrefetchScalarGridSpec(
            num_scalar_prefetch=0,
            grid=(grid_m,),
            in_specs=[
                pl.BlockSpec((tm, D_IN), lambda i: (i, 0)),       # x tile
                pl.BlockSpec((D_IN, D_MID), lambda i: (0, 0)),    # W1^T (resident, bf16)
                pl.BlockSpec((1, D_MID), lambda i: (0, 0)),       # b1
                pl.BlockSpec((D_MID, D_IN), lambda i: (0, 0)),    # g1-folded W2^T (bf16)
                pl.BlockSpec((1, D_IN), lambda i: (0, 0)),        # b2
                pl.BlockSpec((1, D_IN), lambda i: (0, 0)),        # g2 gate
            ],
            out_specs=pl.BlockSpec((tm, D_IN), lambda i: (i, 0)),
        ),
        compiler_params=pltpu.CompilerParams(
            dimension_semantics=("parallel",),
            vmem_limit_bytes=32 * 1024 * 1024,
        ),
    )(x2d, w1t, b1, w2g, b2, g2)

    return out2d.reshape(batch, seq, d)


def init_params(key, ntasks):
    """Deterministic synthetic parameters matching the module's __init__ shapes."""
    ks = jax.random.split(key, 6)
    lim1 = 1.0 / math.sqrt(D_IN)
    lim2 = 1.0 / math.sqrt(D_MID)
    return {
        # torch.nn.Linear(768, 128): weight (128, 768), bias (128,)
        "fc1_w": jax.random.uniform(ks[0], (D_MID, D_IN), jnp.float32, -lim1, lim1),
        "fc1_b": jax.random.uniform(ks[1], (D_MID,), jnp.float32, -lim1, lim1),
        # torch.nn.Linear(128, 768): weight (768, 128), bias (768,)
        "fc2_w": jax.random.uniform(ks[2], (D_IN, D_MID), jnp.float32, -lim2, lim2),
        "fc2_b": jax.random.uniform(ks[3], (D_IN,), jnp.float32, -lim2, lim2),
        # torch.nn.Embedding(ntasks, 128) / (ntasks, 768)
        "efc1": jax.random.normal(ks[4], (ntasks, D_MID), jnp.float32),
        "efc2": jax.random.normal(ks[5], (ntasks, D_IN), jnp.float32),
    }


def _reference(x, params, task, s):
    """Plain-JAX f32 reference mirroring the PyTorch forward (exact GELU)."""
    g1 = jax.nn.sigmoid(s * params["efc1"][task])[None, None, :]
    g2 = jax.nn.sigmoid(s * params["efc2"][task])[None, None, :]
    h = _gelu(x @ params["fc1_w"].T + params["fc1_b"], approximate=False) * g1
    h = _gelu(h @ params["fc2_w"].T + params["fc2_b"], approximate=False) * g2
    return x + h


if __name__ == "__main__":
    key = jax.random.PRNGKey(0)
    k_x, k_p = jax.random.split(key)

    batch, seq = 2, 8          # small shapes; hidden=768 is fixed by the module
    ntasks, task, s = 4, 1, 400.0

    x = jax.random.normal(k_x, (batch, seq, D_IN), jnp.float32)
    params = init_params(k_p, ntasks)

    out = adapter_forward(x, params, task, s)
    out = jax.block_until_ready(out)

    ref = _reference(x, params, task, s)
    assert out.shape == (batch, seq, D_IN)
    assert bool(jnp.all(jnp.isfinite(out)))
    # bf16 MXU operands (f32 accumulate) vs the f32 reference -> looser tolerance.
    assert jnp.allclose(out, ref, atol=2e-2, rtol=2e-2), "mismatch vs reference"

    print("KERNEL_OK")
</pallas_src>

<mosaic_0001>
module attributes {stable_mosaic.version = 11 : i64} {
  func.func @_adapter_kernel(%arg0: i32, %arg1: memref<16x768xf32, #tpu.memory_space<vmem>>, %arg2: memref<768x128xbf16, #tpu.memory_space<vmem>>, %arg3: memref<1x128xf32, #tpu.memory_space<vmem>>, %arg4: memref<128x768xbf16, #tpu.memory_space<vmem>>, %arg5: memref<1x768xf32, #tpu.memory_space<vmem>>, %arg6: memref<1x768xf32, #tpu.memory_space<vmem>>, %arg7: memref<16x768xf32, #tpu.memory_space<vmem>>) attributes {dimension_semantics = [#tpu.dimension_semantics<parallel>], iteration_bounds = array<i64: 1>, scalar_prefetch = 0 : i64, scratch_operands = 0 : i64, tpu.core_type = #tpu.core_type<tc>, window_params = [{transform_indices = @transform_0, window_bounds = array<i64: 16, 768>}, {pipeline_mode = #tpu.pipeline_mode<synchronous>, transform_indices = @transform_1, window_bounds = array<i64: 768, 128>}, {pipeline_mode = #tpu.pipeline_mode<synchronous>, transform_indices = @transform_2, window_bounds = array<i64: 1, 128>}, {pipeline_mode = #tpu.pipeline_mode<synchronous>, transform_indices = @transform_3, window_bounds = array<i64: 128, 768>}, {pipeline_mode = #tpu.pipeline_mode<synchronous>, transform_indices = @transform_4, window_bounds = array<i64: 1, 768>}, {pipeline_mode = #tpu.pipeline_mode<synchronous>, transform_indices = @transform_5, window_bounds = array<i64: 1, 768>}, {transform_indices = @transform_6, window_bounds = array<i64: 16, 768>}]} {
    %c0 = arith.constant 0 : index
    %c0_0 = arith.constant 0 : index
    %0 = vector.load %arg1[%c0, %c0_0] : memref<16x768xf32, #tpu.memory_space<vmem>>, vector<16x768xf32>
    %1 = arith.truncf %0 : vector<16x768xf32> to vector<16x768xbf16>
    %c0_1 = arith.constant 0 : index
    %c0_2 = arith.constant 0 : index
    %2 = vector.load %arg2[%c0_1, %c0_2] : memref<768x128xbf16, #tpu.memory_space<vmem>>, vector<768x128xbf16>
    %cst = arith.constant dense<0.000000e+00> : vector<16x128xf32>
    %3 = tpu.matmul %1, %2, %cst {dimension_numbers = #tpu.dot_dimension_numbers<[1], [0], [0], [1], [0, 0, 1, 1], [], []>} : vector<16x768xbf16>, vector<768x128xbf16>, vector<16x128xf32> -> vector<16x128xf32>
    %c0_3 = arith.constant 0 : index
    %c0_4 = arith.constant 0 : index
    %4 = vector.load %arg3[%c0_3, %c0_4] : memref<1x128xf32, #tpu.memory_space<vmem>>, vector<1x128xf32>
    %5 = vector.broadcast %4 : vector<1x128xf32> to vector<16x128xf32>
    %6 = arith.addf %3, %5 : vector<16x128xf32>
    %cst_5 = arith.constant 5.000000e-01 : f32
    %7 = vector.broadcast %cst_5 : f32 to vector<16x128xf32>
    %8 = arith.mulf %7, %6 : vector<16x128xf32>
    %cst_6 = arith.constant 0.707106769 : f32
    %9 = vector.broadcast %cst_6 : f32 to vector<16x128xf32>
    %10 = arith.mulf %6, %9 : vector<16x128xf32>
    %11 = math.erf %10 : vector<16x128xf32>
    %cst_7 = arith.constant 1.000000e+00 : f32
    %12 = vector.broadcast %cst_7 : f32 to vector<16x128xf32>
    %13 = arith.addf %12, %11 : vector<16x128xf32>
    %14 = arith.mulf %8, %13 : vector<16x128xf32>
    %15 = arith.truncf %14 : vector<16x128xf32> to vector<16x128xbf16>
    %c0_8 = arith.constant 0 : index
    %c0_9 = arith.constant 0 : index
    %16 = vector.load %arg4[%c0_8, %c0_9] : memref<128x768xbf16, #tpu.memory_space<vmem>>, vector<128x768xbf16>
    %cst_10 = arith.constant dense<0.000000e+00> : vector<16x768xf32>
    %17 = tpu.matmul %15, %16, %cst_10 {dimension_numbers = #tpu.dot_dimension_numbers<[1], [0], [0], [1], [0, 0, 1, 1], [], []>} : vector<16x128xbf16>, vector<128x768xbf16>, vector<16x768xf32> -> vector<16x768xf32>
    %c0_11 = arith.constant 0 : index
    %c0_12 = arith.constant 0 : index
    %18 = vector.load %arg5[%c0_11, %c0_12] : memref<1x768xf32, #tpu.memory_space<vmem>>, vector<1x768xf32>
    %19 = vector.broadcast %18 : vector<1x768xf32> to vector<16x768xf32>
    %20 = arith.addf %17, %19 : vector<16x768xf32>
    %cst_13 = arith.constant 5.000000e-01 : f32
    %21 = vector.broadcast %cst_13 : f32 to vector<16x768xf32>
    %22 = arith.mulf %21, %20 : vector<16x768xf32>
    %cst_14 = arith.constant 0.707106769 : f32
    %23 = vector.broadcast %cst_14 : f32 to vector<16x768xf32>
    %24 = arith.mulf %20, %23 : vector<16x768xf32>
    %25 = math.erf %24 : vector<16x768xf32>
    %cst_15 = arith.constant 1.000000e+00 : f32
    %26 = vector.broadcast %cst_15 : f32 to vector<16x768xf32>
    %27 = arith.addf %26, %25 : vector<16x768xf32>
    %28 = arith.mulf %22, %27 : vector<16x768xf32>
    %c0_16 = arith.constant 0 : index
    %c0_17 = arith.constant 0 : index
    %29 = vector.load %arg6[%c0_16, %c0_17] : memref<1x768xf32, #tpu.memory_space<vmem>>, vector<1x768xf32>
    %30 = vector.broadcast %29 : vector<1x768xf32> to vector<16x768xf32>
    %31 = arith.mulf %28, %30 : vector<16x768xf32>
    %32 = arith.addf %0, %31 : vector<16x768xf32>
    %c0_18 = arith.constant 0 : index
    %c0_19 = arith.constant 0 : index
    %33 = vector.load %arg7[%c0_18, %c0_19] : memref<16x768xf32, #tpu.memory_space<vmem>>, vector<16x768xf32>
    tpu.vector_store %arg7[%c0_18, %c0_19], %32 {strides = array<i32>} : memref<16x768xf32, #tpu.memory_space<vmem>>, vector<16x768xf32>,
    return
  }
  func.func @transform_0(%arg0: i32) -> (i32, i32) {
    %c0_i32 = arith.constant 0 : i32
    %c0_i32_0 = arith.constant 0 : i32
    return %arg0, %c0_i32 : i32, i32
  }
  func.func @transform_1(%arg0: i32) -> (i32, i32) {
    %c0_i32 = arith.constant 0 : i32
    %c0_i32_0 = arith.constant 0 : i32
    %c0_i32_1 = arith.constant 0 : i32
    return %c0_i32, %c0_i32_0 : i32, i32
  }
  func.func @transform_2(%arg0: i32) -> (i32, i32) {
    %c0_i32 = arith.constant 0 : i32
    %c0_i32_0 = arith.constant 0 : i32
    %c0_i32_1 = arith.constant 0 : i32
    return %c0_i32, %c0_i32_0 : i32, i32
  }
  func.func @transform_3(%arg0: i32) -> (i32, i32) {
    %c0_i32 = arith.constant 0 : i32
    %c0_i32_0 = arith.constant 0 : i32
    %c0_i32_1 = arith.constant 0 : i32
    return %c0_i32, %c0_i32_0 : i32, i32
  }
  func.func @transform_4(%arg0: i32) -> (i32, i32) {
    %c0_i32 = arith.constant 0 : i32
    %c0_i32_0 = arith.constant 0 : i32
    %c0_i32_1 = arith.constant 0 : i32
    return %c0_i32, %c0_i32_0 : i32, i32
  }
  func.func @transform_5(%arg0: i32) -> (i32, i32) {
    %c0_i32 = arith.constant 0 : i32
    %c0_i32_0 = arith.constant 0 : i32
    %c0_i32_1 = arith.constant 0 : i32
    return %c0_i32, %c0_i32_0 : i32, i32
  }
  func.func @transform_6(%arg0: i32) -> (i32, i32) {
    %c0_i32 = arith.constant 0 : i32
    %c0_i32_0 = arith.constant 0 : i32
    return %arg0, %c0_i32 : i32, i32
  }
}

</mosaic_0001>

<bundles_post_ra>
// kernel: tpu_custom_call.1
= control target key start
LH: loop header
LB: loop body
LE: loop exit
PB: predicated region body
PF: predicated region fallthrough
CT: control target
= control target key end

     0   :  { %11 = vsyncpa [#allocation3], 0  ;;  %s2917_s0 = inlined_call_operand.hbm [shape: f32[16,768], index: 0, kind: input, shape index: {}]   ;;  %s2918_s1 = inlined_call_operand.hbm [shape: bf16[768,128], index: 1, kind: input, shape index: {}]   ;;  %s2919_s2 = inlined_call_operand.vmem [shape: f32[1,128], index: 2, kind: input, shape index: {}]   ;;  %s2920_s3 = inlined_call_operand.hbm [shape: bf16[128,768], index: 3, kind: input, shape index: {}]   ;;  %s2921_s4 = inlined_call_operand.hbm [shape: f32[1,768], index: 4, kind: input, shape index: {}]   ;;  %s2922_s5 = inlined_call_operand.hbm [shape: f32[1,768], index: 5, kind: input, shape index: {}]   ;;  %s2923_s6 = inlined_call_operand.hbm [shape: f32[16,768], index: 6, kind: output, shape index: {}]  }
   0x1   :  { %12 = vsyncpa [#allocation6], 0 }
   0x2   :  { %13 = vsyncpa [#allocation9], 0  ;;  %s32_s23 = sshll.u32 %s2918_s1, 4  ;;  %s33_s23 = int_to_ptr.hbm [resolvable:$true] %s32_s23 }
   0x3   :  { %14 = vsyncpa [#allocation4], 0  ;;  %s2361_s24 = smov [#allocation5]   ;;  %s61_s28 = sshll.u32 %s2921_s4, 4  ;;  %s62_s28 = int_to_ptr.hbm [resolvable:$true] %s61_s28 }
   0x4   :  { %s34_s25 = sshll.u32 %s2361_s24, 4  ;;  %s2362_s29 = smov 64   ;;  %s35_s25 = int_to_ptr.vmem [resolvable:$true] %s34_s25 }
   0x5   :  { %s2363_s30 = smov 4   ;;  %s2364_s7 = smov [#allocation8]  }
   0x6   :  { %40 = dma.hbm_to_vmem [thread:$0]  %s33_s23, 6144, %s35_s25, [#allocation6], %s2362_s29, %s2362_s29, %s2363_s30  }
   0x7   :  { %s63_s8 = sshll.u32 %s2364_s7, 4  ;;  %s19_s11 = sshll.u32 %s2917_s0, 4  ;;  %s64_s8 = int_to_ptr.vmem [resolvable:$true] %s63_s8  ;;  %s20_s11 = int_to_ptr.hbm [resolvable:$true] %s19_s11 }
   0x8   :  { %66 = dma.hbm_to_vmem [thread:$0]  %s62_s28, 96, %s64_s8, [#allocation9]  }
   0x9   :  { %s2365_s1 = smov [#allocation2]   ;;  %s47_s4 = sshll.u32 %s2920_s3, 4  ;;  %s48_s4 = int_to_ptr.hbm [resolvable:$true] %s47_s4 }
   0xa   :  { %s21_s12 = sshll.u32 %s2365_s1, 4  ;;  %s2366_s15 = smov 768   ;;  %s22_s12 = int_to_ptr.vmem [resolvable:$true] %s21_s12 }
   0xb   :  { %s2367_s16 = smov 48   ;;  %s2368_s17 = smov [#allocation7]  }
   0xc   :  { %27 = dma.hbm_to_vmem [thread:$0]  %s20_s11, 1536, %s22_s12, [#allocation3], %s2366_s15, %s2366_s15, %s2367_s16  }
   0xd   :  { %s49_s18 = sshll.u32 %s2368_s17, 4  ;;  %s2369_s0 = smov 384   ;;  %s50_s18 = int_to_ptr.vmem [resolvable:$true] %s49_s18 }
   0xe   :  { %s2370_s19 = smov 24   ;;  %s72_s22 = sshll.u32 %s2922_s5, 4  ;;  %s73_s22 = int_to_ptr.hbm [resolvable:$true] %s72_s22 }
   0xf   :  { %55 = dma.hbm_to_vmem [thread:$0]  %s48_s4, 6144, %s50_s18, [#allocation6], %s2369_s0, %s2369_s0, %s2370_s19  }
  0x10   :  { %s2371_s23 = smov [#allocation10]  }
  0x11   :  { %s74_s3 = sshll.u32 %s2371_s23, 4  ;;  %s75_s3 = int_to_ptr.vmem [resolvable:$true] %s74_s3 }
  0x12   :  { %77 = dma.hbm_to_vmem [thread:$0]  %s73_s22, 96, %s75_s3, [#allocation9]  }
  0x13   :  { %2353 = dma.done.wait [#allocation3], 1536  }
  0x14   :  { %2354 = vsyncadd [#allocation3], 4294965760 }
  0x15   :  { %2355 = dma.done.wait [#allocation6], 12288  }
  0x16   :  { %2356 = vsyncadd [#allocation6], 4294955008 }
  0x17   :  { %2357 = dma.done.wait [#allocation9], 192  }
  0x18   :  { %2358 = vsyncadd [#allocation9], 4294967104  ;;  %v2067_v0 = vld [vmem:[#allocation5 + $0x38] sm:$0xff]  ;;  %v2066_v4 = vld [vmem:[#allocation5 + $0x30] sm:$0xff]  ;;  %s1647_s28 = sshll.u32 %s2923_s6, 4  ;;  %s1648_s28 = int_to_ptr.hbm [resolvable:$true] %s1647_s28 }
  0x19   :  { %v2075_v1 = vld [vmem:[#allocation5 + $0x78] sm:$0xff]  ;;  %504 = vmatpush.bf16.msra.mxu0 %v2067_v0  ;;  %v2074_v5 = vld [vmem:[#allocation5 + $0x70] sm:$0xff]  ;;  %v2065_v8 = vld [vmem:[#allocation5 + $0x28] sm:$0xff] }
  0x1a   :  { %v2083_v2 = vld [vmem:[#allocation5 + $0xb8] sm:$0xff]  ;;  %518 = vmatpush.bf16.msra.mxu1 %v2075_v1  ;;  %v2082_v6 = vld [vmem:[#allocation5 + $0xb0] sm:$0xff]  ;;  %v2073_v9 = vld [vmem:[#allocation5 + $0x68] sm:$0xff] }
  0x1b   :  { %v2091_v3 = vld [vmem:[#allocation5 + $0xf8] sm:$0xff]  ;;  %532 = vmatpush.bf16.msra.mxu2 %v2083_v2  ;;  %v2090_v7 = vld [vmem:[#allocation5 + $0xf0] sm:$0xff]  ;;  %v2081_v10 = vld [vmem:[#allocation5 + $0xa8] sm:$0xff] }
  0x1c   :  { %546 = vmatpush.bf16.msra.mxu3 %v2091_v3  ;;  %v2089_v11 = vld [vmem:[#allocation5 + $0xe8] sm:$0xff]  ;;  %v2064_v12 = vld [vmem:[#allocation5 + $0x20] sm:$0xff]  ;;  %v2063_v16 = vld [vmem:[#allocation5 + $0x18] sm:$0xff] }
  0x1d   :  { %505 = vmatpush.bf16.msra.mxu0 %v2066_v4  ;;  %v2072_v13 = vld [vmem:[#allocation5 + $0x60] sm:$0xff]  ;;  %v2071_v17 = vld [vmem:[#allocation5 + $0x58] sm:$0xff]  ;;  %v2062_v20 = vld [vmem:[#allocation5 + $0x10] sm:$0xff] }
  0x1e   :  { %519 = vmatpush.bf16.msra.mxu1 %v2074_v5  ;;  %v2080_v14 = vld [vmem:[#allocation5 + $0xa0] sm:$0xff]  ;;  %v2079_v18 = vld [vmem:[#allocation5 + $0x98] sm:$0xff]  ;;  %v2070_v21 = vld [vmem:[#allocation5 + $0x50] sm:$0xff] }
  0x1f   :  { %533 = vmatpush.bf16.msra.mxu2 %v2082_v6  ;;  %v2088_v15 = vld [vmem:[#allocation5 + $0xe0] sm:$0xff]  ;;  %v2087_v19 = vld [vmem:[#allocation5 + $0xd8] sm:$0xff]  ;;  %v2078_v22 = vld [vmem:[#allocation5 + $0x90] sm:$0xff] }
  0x20   :  { %547 = vmatpush.bf16.msra.mxu3 %v2090_v7  ;;  %v2086_v23 = vld [vmem:[#allocation5 + $0xd0] sm:$0xff]  ;;  %v2061_v24 = vld [vmem:[#allocation5 + $0x8] sm:$0xff]  ;;  %v2060_v28 = vld [vmem:[#allocation5] sm:$0xff] }
  0x21   :  { %506 = vmatpush.bf16.msra.mxu0 %v2065_v8  ;;  %v2069_v25 = vld [vmem:[#allocation5 + $0x48] sm:$0xff]  ;;  %v2068_v29 = vld [vmem:[#allocation5 + $0x40] sm:$0xff]  ;;  %v104_v31 = vld [vmem:[#allocation2 + $0x30] sm:$0xff] }
  0x22   :  { %520 = vmatpush.bf16.msra.mxu1 %v2073_v9  ;;  %v2077_v26 = vld [vmem:[#allocation5 + $0x88] sm:$0xff]  ;;  %v98_v30 = vld [vmem:[#allocation2] sm:$0xff]  ;;  %v105_v33 = vld [vmem:[#allocation2 + $0x38] sm:$0xff] }
  0x23   :  { %534 = vmatpush.bf16.msra.mxu2 %v2081_v10  ;;  %v2085_v27 = vld [vmem:[#allocation5 + $0xc8] sm:$0xff]  ;;  %v2099_v34 = vld [vmem:[#allocation5 + $0x138] sm:$0xff]  ;;  %v2076_v36 = vld [vmem:[#allocation5 + $0x80] sm:$0xff]  ;;  %v110_v40 = vpack.c.bf16 %v104_v31, %v98_v30 }
  0x24   :  { %548 = vmatpush.bf16.msra.mxu3 %v2089_v11  ;;  %v99_v32 = vld [vmem:[#allocation2 + $0x8] sm:$0xff]  ;;  %v2107_v35 = vld [vmem:[#allocation5 + $0x178] sm:$0xff]  ;;  %v2084_v37 = vld [vmem:[#allocation5 + $0xc0] sm:$0xff] }
  0x25   :  { %507 = vmatpush.bf16.msra.mxu0 %v2064_v12  ;;  %v100_v38 = vld [vmem:[#allocation2 + $0x10] sm:$0xff]  ;;  %v106_v39 = vld [vmem:[#allocation2 + $0x40] sm:$0xff]  ;;  %v101_v41 = vld [vmem:[#allocation2 + $0x18] sm:$0xff]  ;;  %v111_v43 = vpack.c.bf16 %v105_v33, %v99_v32 }
  0x26   :  { %521 = vmatpush.bf16.msra.mxu1 %v2072_v13  ;;  %v107_v42 = vld [vmem:[#allocation2 + $0x48] sm:$0xff]  ;;  %v2098_v44 = vld [vmem:[#allocation5 + $0x130] sm:$0xff]  ;;  %v112_v46 = vpack.c.bf16 %v106_v39, %v100_v38  ;;  %v2096_v50 = vld [vmem:[#allocation5 + $0x120] sm:$0xff] }
  0x27   :  { %535 = vmatpush.bf16.msra.mxu2 %v2080_v14  ;;  %v2106_v45 = vld [vmem:[#allocation5 + $0x170] sm:$0xff]  ;;  %v113_v47 = vpack.c.bf16 %v107_v42, %v101_v41  ;;  %v2097_v48 = vld [vmem:[#allocation5 + $0x128] sm:$0xff]  ;;  %v2104_v51 = vld [vmem:[#allocation5 + $0x160] sm:$0xff] }
  0x28   :  { %549 = vmatpush.bf16.msra.mxu3 %v2088_v15  ;;  %v2105_v49 = vld [vmem:[#allocation5 + $0x168] sm:$0xff]  ;;  %v2095_v52 = vld [vmem:[#allocation5 + $0x118] sm:$0xff]  ;;  %v2094_v54 = vld [vmem:[#allocation5 + $0x110] sm:$0xff] }
  0x29   :  { %508 = vmatpush.bf16.msra.mxu0 %v2063_v16  ;;  %v2103_v53 = vld [vmem:[#allocation5 + $0x158] sm:$0xff]  ;;  %v2102_v55 = vld [vmem:[#allocation5 + $0x150] sm:$0xff]  ;;  %v2093_v56 = vld [vmem:[#allocation5 + $0x108] sm:$0xff] }
  0x2a   :  { %522 = vmatpush.bf16.msra.mxu1 %v2071_v17  ;;  %v2101_v57 = vld [vmem:[#allocation5 + $0x148] sm:$0xff]  ;;  %v2092_v58 = vld [vmem:[#allocation5 + $0x100] sm:$0xff]  ;;  %v108_v61 = vld [vmem:[#allocation2 + $0x50] sm:$0xff] }
  0x2b   :  { %536 = vmatpush.bf16.msra.mxu2 %v2079_v18  ;;  %v2100_v59 = vld [vmem:[#allocation5 + $0x140] sm:$0xff]  ;;  %v103_v62 = vld [vmem:[#allocation2 + $0x28] sm:$0xff]  ;;  %v109_v63 = vld [vmem:[#allocation2 + $0x58] sm:$0xff] }
  0x2c   :  { %550 = vmatpush.bf16.msra.mxu3 %v2087_v19  ;;  %v102_v60 = vld [vmem:[#allocation2 + $0x20] sm:$0xff]  ;;  %v115_v1 = vpack.c.bf16 %v109_v63, %v103_v62  ;;  %v2026_v7 = vld [vmem:[#allocation7 + $0x150] sm:$0xf]  ;;  %v2153_v8 = vld [vmem:[#allocation7 + $0x164] sm:$0xf0] }
  0x2d   :  { %509 = vmatpush.bf16.msra.mxu0 %v2062_v20  ;;  %v114_v0 = vpack.c.bf16 %v108_v61, %v102_v60  ;;  %v2168_v4 = vld [vmem:[%s2919_s2] ss:$0 sm:$0xff]  ;;  %v2150_v9 = vld [vmem:[#allocation7 + $0x154] sm:$0xf]  ;;  %v2027_v10 = vor.u32 %v2153_v8, %v2026_v7  ;;  %v2028_v11 = vld [vmem:[#allocation7 + $0x168] sm:$0xf0] }
  0x2e   :  { %523 = vmatpush.bf16.msra.mxu1 %v2070_v21  ;;  %v2031_v13 = vor.u32 %v2150_v9, %v2028_v11  ;;  %v2002_v16 = vld [vmem:[#allocation7 + $0x120] sm:$0xf]  ;;  %v2147_v17 = vld [vmem:[#allocation7 + $0x134] sm:$0xf0]  ;;  %v2144_v18 = vld [vmem:[#allocation7 + $0x124] sm:$0xf] }
  0x2f   :  { %537 = vmatpush.bf16.msra.mxu2 %v2078_v22  ;;  %v2003_v20 = vor.u32 %v2147_v17, %v2002_v16  ;;  %v2004_v21 = vld [vmem:[#allocation7 + $0x138] sm:$0xf0]  ;;  %v2135_v38 = vld [vmem:[#allocation7 + $0xd4] sm:$0xf0]  ;;  %v2132_v39 = vld [vmem:[#allocation7 + $0xc4] sm:$0xf] }
  0x30   :  { %551 = vmatpush.bf16.msra.mxu3 %v2086_v23  ;;  %v1956_v41 = vld [vmem:[#allocation7 + $0xd8] sm:$0xf0]  ;;  %v2034_v42 = vld [vmem:[#allocation7 + $0x158] sm:$0xf]  ;;  %v2010_v61 = vld [vmem:[#allocation7 + $0x128] sm:$0xf] }
  0x31   :  { %510 = vmatpush.bf16.msra.mxu0 %v2061_v24  ;;  %v2007_v24 = vor.u32 %v2144_v18, %v2004_v21  ;;  %v2148_v62 = vld [vmem:[#allocation7 + $0x13c] sm:$0xf0]  ;;  %v2145_v63 = vld [vmem:[#allocation7 + $0x12c] sm:$0xf]  ;;  %v2123_v7 = vld [vmem:[#allocation7 + $0x74] sm:$0xf0] }
  0x32   :  { %524 = vmatpush.bf16.msra.mxu1 %v2069_v25  ;;  %v1978_v25 = vld [vmem:[#allocation7 + $0xf0] sm:$0xf]  ;;  %v1908_v11 = vld [vmem:[#allocation7 + $0x78] sm:$0xf0]  ;;  %s2372_s2 = smov [#allocation11]  }
  0x33   :  { %538 = vmatpush.bf16.msra.mxu2 %v2077_v26  ;;  %v2141_v26 = vld [vmem:[#allocation7 + $0x104] sm:$0xf0]  ;;  %v2142_v17 = vld [vmem:[#allocation7 + $0x10c] sm:$0xf0]  ;;  %s1645_s25 = sshll.u32 %s2372_s2, 4  ;;  %s1646_s25 = int_to_ptr.vmem [resolvable:$true] %s1645_s25 }
  0x34   :  { %552 = vmatpush.bf16.msra.mxu3 %v2085_v27  ;;  %v2138_v27 = vld [vmem:[#allocation7 + $0xf4] sm:$0xf] }
  0x35   :  { %511 = vmatpush.bf16.msra.mxu0 %v2060_v28  ;;  %v1979_v28 = vor.u32 %v2141_v26, %v1978_v25  ;;  %v1882_v25 = vld [vmem:[#allocation7 + $0x30] sm:$0xf]  ;;  %v2117_v26 = vld [vmem:[#allocation7 + $0x44] sm:$0xf0] }
  0x36   :  { %525 = vmatpush.bf16.msra.mxu1 %v2068_v29  ;;  %v1980_v29 = vld [vmem:[#allocation7 + $0x108] sm:$0xf0] }
  0x37   :  { %539 = vmatpush.bf16.msra.mxu2 %v2076_v36  ;;  %v1983_v33 = vor.u32 %v2138_v27, %v1980_v29  ;;  %v1883_v29 = vor.u32 %v2117_v26, %v1882_v25  ;;  %v2146_v25 = vld [vmem:[#allocation7 + $0x134] sm:$0xf]  ;;  %v2020_v26 = vld [vmem:[#allocation7 + $0x148] sm:$0xf0] }
  0x38   :  { %553 = vmatpush.bf16.msra.mxu3 %v2084_v37  ;;  %512 = vmatmul.bf16.vlgmr.msra.gmra.mxu0 %v110_v40  ;;  %v1954_v37 = vld [vmem:[#allocation7 + $0xc0] sm:$0xf] }
  0x39   :  { %560 = vmatpush.bf16.msrb.mxu0 %v2099_v34  ;;  %526 = vmatmul.bf16.vlgmr.msra.gmra.mxu1 %v111_v43  ;;  %v1955_v40 = vor.u32 %v2135_v38, %v1954_v37  ;;  %v2154_v43 = vld [vmem:[#allocation7 + $0x16c] sm:$0xf0]  ;;  %v1964_v37 = vld [vmem:[#allocation7 + $0xe0] sm:$0xf0] }
  0x3a   :  { %574 = vmatpush.bf16.msrb.mxu1 %v2107_v35  ;;  %540 = vmatmul.bf16.vlgmr.msra.gmra.mxu2 %v112_v46  ;;  %v1959_v46 = vor.u32 %v2132_v39, %v1956_v41 }
  0x3b   :  { %554 = vmatmul.bf16.vlgmr.msra.gmra.mxu3 %v113_v47  ;;  %979 = vmatpush.bf16.msrb.mxu2 %v2027_v10  ;;  %v2035_v47 = vor.u32 %v2154_v43, %v2034_v42  ;;  %v2120_v10 = vld [vmem:[#allocation7 + $0x64] sm:$0xf]  ;;  %v1858_v42 = vld [vmem:[#allocation7] sm:$0xf] }
  0x3c   :  { %993 = vmatpush.bf16.msrb.mxu3 %v2031_v13  ;;  %v1911_v16 = vor.u32 %v2120_v10, %v1908_v11  ;;  %v1914_v10 = vld [vmem:[#allocation7 + $0x68] sm:$0xf]  ;;  %v2124_v11 = vld [vmem:[#allocation7 + $0x7c] sm:$0xf0] }
  0x3d   :  { %561 = vmatpush.bf16.msrb.mxu0 %v2098_v44 }
  0x3e   :  { %575 = vmatpush.bf16.msrb.mxu1 %v2106_v45 }
  0x3f   :  { %980 = vmatpush.bf16.msrb.mxu2 %v2003_v20  ;;  %v1988_v20 = vld [vmem:[#allocation7 + $0x110] sm:$0xf0] }
  0x40   :  { %994 = vmatpush.bf16.msrb.mxu3 %v2007_v24 }
  0x41   :  { %562 = vmatpush.bf16.msrb.mxu0 %v2097_v48  ;;  %v2151_v48 = vld [vmem:[#allocation7 + $0x15c] sm:$0xf] }
  0x42   :  { %576 = vmatpush.bf16.msrb.mxu1 %v2105_v49  ;;  %v2036_v49 = vld [vmem:[#allocation7 + $0x170] sm:$0xf0] }
  0x43   :  { %981 = vmatpush.bf16.msrb.mxu2 %v1979_v28 }
  0x44   :  { %995 = vmatpush.bf16.msrb.mxu3 %v1983_v33 }
  0x45   :  { %563 = vmatpush.bf16.msrb.mxu0 %v2096_v50 }
  0x46   :  { %577 = vmatpush.bf16.msrb.mxu1 %v2104_v51  ;;  %v2039_v51 = vor.u32 %v2151_v48, %v2036_v49  ;;  %v1860_v49 = vld [vmem:[#allocation7 + $0x18] sm:$0xf0] }
  0x47   :  { %982 = vmatpush.bf16.msrb.mxu2 %v1955_v40 }
  0x48   :  { %996 = vmatpush.bf16.msrb.mxu3 %v1959_v46  ;;  %v2108_v46 = vld [vmem:[#allocation7 + $0x4] sm:$0xf] }
  0x49   :  { %564 = vmatpush.bf16.msrb.mxu0 %v2095_v52 }
  0x4a   :  { %578 = vmatpush.bf16.msrb.mxu1 %v2103_v53  ;;  %v1930_v53 = vld [vmem:[#allocation7 + $0x90] sm:$0xf] }
  0x4d   :  { %565 = vmatpush.bf16.msrb.mxu0 %v2094_v54  ;;  %v2129_v54 = vld [vmem:[#allocation7 + $0xa4] sm:$0xf0] }
  0x4e   :  { %579 = vmatpush.bf16.msrb.mxu1 %v2102_v55  ;;  %v2126_v55 = vld [vmem:[#allocation7 + $0x94] sm:$0xf] }
  0x51   :  { %566 = vmatpush.bf16.msrb.mxu0 %v2093_v56  ;;  %v1932_v56 = vld [vmem:[#allocation7 + $0xa8] sm:$0xf0] }
  0x52   :  { %580 = vmatpush.bf16.msrb.mxu1 %v2101_v57  ;;  %v1935_v60 = vor.u32 %v2126_v55, %v1932_v56  ;;  %v1863_v55 = vor.u32 %v2108_v46, %v1860_v49 }
  0x54   :  { %997 = vmatpush.bf16.msrb.mxu3 %v1935_v60  ;;  %v1940_v60 = vld [vmem:[#allocation7 + $0xb0] sm:$0xf0] }
  0x55   :  { %567 = vmatpush.bf16.msrb.mxu0 %v2092_v58 }
  0x56   :  { %581 = vmatpush.bf16.msrb.mxu1 %v2100_v59  ;;  %v1931_v59 = vor.u32 %v2129_v54, %v1930_v53 }
  0x58   :  { %568 = vmatmul.bf16.vlgmr.msrb.gmra.mxu0 %v114_v0  ;;  %983 = vmatpush.bf16.msrb.mxu2 %v1931_v59 }
  0x59   :  { %582 = vmatmul.bf16.vlgmr.msrb.gmra.mxu1 %v115_v1  ;;  %1007 = vmatpush.bf16.msra.mxu0 %v2035_v47  ;;  %v2011_v1 = vor.u32 %v2148_v62, %v2010_v61 }
  0x5a   :  { %1021 = vmatpush.bf16.msra.mxu1 %v2039_v51  ;;  %998 = vmatpush.bf16.msrb.mxu3 %v1911_v16  ;;  %v2130_v51 = vld [vmem:[#allocation7 + $0xac] sm:$0xf0]  ;;  %v1915_v16 = vor.u32 %v2124_v11, %v1914_v10 }
  0x5d   :  { %1008 = vmatpush.bf16.msra.mxu0 %v2011_v1 }
  0xb5   :  { %v513_v2 = vpop.f32.mrf.mxu0 }
  0xb6   :  { %v527_v3 = vpop.f32.mrf.mxu1  ;;  %v514_v5 = vadd.f32 %v2168_v4, %v513_v2  ;;  %v2012_v2 = vld [vmem:[#allocation7 + $0x140] sm:$0xf0] }
  0xb8   :  { %v528_v12 = vadd.f32 %v527_v3, %v514_v5  ;;  %v2015_v5 = vor.u32 %v2145_v63, %v2012_v2  ;;  %v2155_v2 = vld [vmem:[#allocation7 + $0x174] sm:$0xf0] }
  0xba   :  { %1022 = vmatpush.bf16.msra.mxu1 %v2015_v5  ;;  %v2044_v5 = vld [vmem:[#allocation7 + $0x178] sm:$0xf0] }
  0xbd   :  { %v541_v6 = vpop.f32.mrf.mxu2  ;;  %v515_v14 = vpop.f32.mrf.mxu0 }
  0xbe   :  { %v529_v15 = vpop.f32.mrf.mxu1  ;;  %v555_v19 = vpop.f32.mrf.mxu3  ;;  %v542_v22 = vadd.f32 %v541_v6, %v528_v12  ;;  %v516_v23 = vadd.f32 %v2168_v4, %v515_v14  ;;  %v1906_v6 = vld [vmem:[#allocation7 + $0x60] sm:$0xf]  ;;  %v1986_v12 = vld [vmem:[#allocation7 + $0xf8] sm:$0xf] }
  0xbf   :  { %v1907_v9 = vor.u32 %v2123_v7, %v1906_v6  ;;  %v1987_v18 = vor.u32 %v2142_v17, %v1986_v12  ;;  %v2121_v12 = vld [vmem:[#allocation7 + $0x6c] sm:$0xf]  ;;  %v1916_v17 = vld [vmem:[#allocation7 + $0x80] sm:$0xf0] }
  0xc0   :  { %v556_v30 = vadd.f32 %v555_v19, %v542_v22  ;;  %v530_v31 = vadd.f32 %v529_v15, %v516_v23  ;;  %v2139_v19 = vld [vmem:[#allocation7 + $0xfc] sm:$0xf] }
  0xc1   :  { %984 = vmatpush.bf16.msrb.mxu2 %v1907_v9  ;;  %v1991_v23 = vor.u32 %v2139_v19, %v1988_v20  ;;  %1009 = vmatpush.bf16.msra.mxu0 %v1987_v18  ;;  %v1919_v20 = vor.u32 %v2121_v12, %v1916_v17  ;;  %v2122_v17 = vld [vmem:[#allocation7 + $0x74] sm:$0xf] }
  0xc3   :  { %1023 = vmatpush.bf16.msra.mxu1 %v1991_v23  ;;  %v2149_v23 = vld [vmem:[#allocation7 + $0x144] sm:$0xf0] }
  0xc5   :  { %v543_v32 = vpop.f32.mrf.mxu2  ;;  %985 = vmatpush.bf16.msrb.mxu2 %v1883_v29  ;;  %v2023_v29 = vor.u32 %v2146_v25, %v2020_v26 }
  0xc6   :  { %v544_v44 = vadd.f32 %v543_v32, %v530_v31  ;;  %v557_v50 = vpop.f32.mrf.mxu3  ;;  %v1884_v31 = vld [vmem:[#allocation7 + $0x48] sm:$0xf0]  ;;  %v1962_v32 = vld [vmem:[#allocation7 + $0xc8] sm:$0xf] }
  0xc8   :  { %v558_v57 = vadd.f32 %v557_v50, %v544_v44  ;;  %v2111_v44 = vld [vmem:[#allocation7 + $0x14] sm:$0xf0] }
  0xc9   :  { %v1859_v48 = vor.u32 %v2111_v44, %v1858_v42  ;;  %v1938_v50 = vld [vmem:[#allocation7 + $0x98] sm:$0xf]  ;;  %v2140_v42 = vld [vmem:[#allocation7 + $0x104] sm:$0xf] }
  0xca   :  { %v1939_v56 = vor.u32 %v2130_v51, %v1938_v50  ;;  %v2112_v50 = vld [vmem:[#allocation7 + $0x1c] sm:$0xf0]  ;;  %v2109_v51 = vld [vmem:[#allocation7 + $0xc] sm:$0xf] }
  0xcb   :  { %986 = vmatpush.bf16.msrb.mxu2 %v1859_v48  ;;  %v1866_v48 = vld [vmem:[#allocation7 + $0x8] sm:$0xf] }
  0xd5   :  { %v569_v34 = vpop.f32.mrf.mxu0 }
  0xd6   :  { %v583_v35 = vpop.f32.mrf.mxu1  ;;  %v570_v36 = vadd.f32 %v569_v34, %v556_v30  ;;  %v2114_v30 = vld [vmem:[#allocation7 + $0x34] sm:$0xf] }
  0xd7   :  { %v1887_v34 = vor.u32 %v2114_v30, %v1884_v31  ;;  %v1890_v30 = vld [vmem:[#allocation7 + $0x38] sm:$0xf]  ;;  %v2118_v31 = vld [vmem:[#allocation7 + $0x4c] sm:$0xf0] }
  0xd8   :  { %v2429_v45 = vadd.f32 %v583_v35, %v570_v36  ;;  %v2136_v35 = vld [vmem:[#allocation7 + $0xdc] sm:$0xf0]  ;;  %v2133_v36 = vld [vmem:[#allocation7 + $0xcc] sm:$0xf] }
  0xd9   :  { %v1963_v40 = vor.u32 %v2136_v35, %v1962_v32  ;;  %v1967_v41 = vor.u32 %v2133_v36, %v1964_v37  ;;  %999 = vmatpush.bf16.msrb.mxu3 %v1887_v34  ;;  %v2115_v32 = vld [vmem:[#allocation7 + $0x3c] sm:$0xf]  ;;  %v1891_v34 = vor.u32 %v2118_v31, %v1890_v30  ;;  %v1892_v35 = vld [vmem:[#allocation7 + $0x50] sm:$0xf0]  ;;  %v2116_v30 = vld [vmem:[#allocation7 + $0x44] sm:$0xf] }
  0xda   :  { %v2432_v52 = vmul.f32 0.70710677, %v2429_v45  ;;  %v1900_v31 = vld [vmem:[#allocation7 + $0x58] sm:$0xf0] }
  0xdb   :  { %1010 = vmatpush.bf16.msra.mxu0 %v1963_v40  ;;  %1024 = vmatpush.bf16.msra.mxu1 %v1967_v41  ;;  %v1994_v40 = vld [vmem:[#allocation7 + $0x100] sm:$0xf]  ;;  %v2143_v41 = vld [vmem:[#allocation7 + $0x114] sm:$0xf0] }
  0xdc   :  { %v592_v58 = vmul.f32 %v2432_v52, %v2432_v52  ;;  %v1995_v46 = vor.u32 %v2143_v41, %v1994_v40  ;;  %v1874_v40 = vld [vmem:[#allocation7 + $0x10] sm:$0xf]  ;;  %v2113_v41 = vld [vmem:[#allocation7 + $0x24] sm:$0xf0] }
  0xdd   :  { %v571_v0 = vpop.f32.mrf.mxu0  ;;  %1000 = vmatpush.bf16.msrb.mxu3 %v1863_v55 }
  0xde   :  { %v2436_v3 = vmin.f32 %v592_v58, 16.0  ;;  %v572_v4 = vadd.f32 %v571_v0, %v558_v57  ;;  %v585_v8 = vpop.f32.mrf.mxu1  ;;  %v2127_v57 = vld [vmem:[#allocation7 + $0x9c] sm:$0xf]  ;;  %v2042_v0 = vld [vmem:[#allocation7 + $0x160] sm:$0xf] }
  0xdf   :  { %v1943_v63 = vor.u32 %v2127_v57, %v1940_v60  ;;  %1011 = vmatpush.bf16.msra.mxu0 %v1939_v56  ;;  %v1867_v56 = vor.u32 %v2112_v50, %v1866_v48  ;;  %v1868_v57 = vld [vmem:[#allocation7 + $0x20] sm:$0xf0]  ;;  %v1875_v50 = vor.u32 %v2113_v41, %v1874_v40 }
  0xe0   :  { %v594_v13 = vmul.f32 2.1237322e-06, %v2436_v3  ;;  %v605_v14 = vmul.f32 3.8918573e-05, %v2436_v3  ;;  %v2440_v15 = vadd.f32 %v585_v8, %v572_v4  ;;  %v2152_v4 = vld [vmem:[#allocation7 + $0x164] sm:$0xf]  ;;  %v2043_v8 = vor.u32 %v2155_v2, %v2042_v0 }
  0xe1   :  { %1025 = vmatpush.bf16.msra.mxu1 %v1943_v63  ;;  %v2047_v9 = vor.u32 %v2152_v4, %v2044_v5  ;;  %v2134_v63 = vld [vmem:[#allocation7 + $0xd4] sm:$0xf]  ;;  %v1972_v0 = vld [vmem:[#allocation7 + $0xe8] sm:$0xf0]  ;;  %v2131_v5 = vld [vmem:[#allocation7 + $0xb4] sm:$0xf0] }
  0xe2   :  { %v595_v21 = vadd.f32 0.00028619796, %v594_v13  ;;  %v606_v22 = vadd.f32 0.001143296, %v605_v14  ;;  %v2443_v24 = vmul.f32 0.70710677, %v2440_v15  ;;  %1035 = vmatpush.bf16.msra.mxu2 %v2043_v8  ;;  %v1975_v4 = vor.u32 %v2134_v63, %v1972_v0 }
  0xe3   :  { %1049 = vmatpush.bf16.msra.mxu3 %v2047_v9  ;;  %1012 = vmatpush.bf16.msra.mxu0 %v1915_v16  ;;  %v588_v63 = vmul.f32 0.5, %v2429_v45  ;;  %v589_v0 = vmul.f32 0.5, %v2440_v15 }
  0xe4   :  { %v596_v27 = vmul.f32 %v595_v21, %v2436_v3  ;;  %v607_v28 = vmul.f32 %v606_v22, %v2436_v3  ;;  %v632_v33 = vmul.f32 %v2443_v24, %v2443_v24  ;;  %v2018_v21 = vld [vmem:[#allocation7 + $0x130] sm:$0xf] }
  0xe5   :  { %1026 = vmatpush.bf16.msra.mxu1 %v1919_v20 }
  0xe6   :  { %v597_v38 = vadd.f32 0.0036580483, %v596_v27  ;;  %v608_v39 = vadd.f32 0.014752088, %v607_v28  ;;  %v2449_v43 = vmin.f32 %v632_v33, 16.0  ;;  %v2019_v28 = vor.u32 %v2149_v23, %v2018_v21 }
  0xe7   :  { %1050 = vmatpush.bf16.msra.mxu3 %v2023_v29  ;;  %1013 = vmatpush.bf16.msra.mxu0 %v1891_v34 }
  0xe8   :  { %v609_v47 = vmul.f32 %v608_v39, %v2436_v3  ;;  %v634_v53 = vmul.f32 2.1237322e-06, %v2449_v43  ;;  %v645_v54 = vmul.f32 3.8918573e-05, %v2449_v43  ;;  %v598_v58 = vmul.f32 %v597_v38, %v2436_v3  ;;  %1036 = vmatpush.bf16.msra.mxu2 %v2019_v28  ;;  %v2119_v28 = vld [vmem:[#allocation7 + $0x54] sm:$0xf0] }
  0xe9   :  { %v1895_v39 = vor.u32 %v2115_v32, %v1892_v35 }
  0xea   :  { %v610_v59 = vadd.f32 0.112945676, %v609_v47  ;;  %v635_v61 = vadd.f32 0.00028619796, %v634_v53  ;;  %v646_v62 = vadd.f32 0.001143296, %v645_v54 }
  0xeb   :  { %v599_v13 = vadd.f32 0.05243302, %v598_v58  ;;  %1027 = vmatpush.bf16.msra.mxu1 %v1895_v39  ;;  %v1996_v47 = vld [vmem:[#allocation7 + $0x118] sm:$0xf0]  ;;  %v1970_v58 = vld [vmem:[#allocation7 + $0xd0] sm:$0xf]  ;;  %1014 = vmatpush.bf16.msra.mxu0 %v1867_v56  ;;  %v1903_v39 = vor.u32 %v2116_v30, %v1900_v31 }
  0xec   :  { %v611_v1 = vmul.f32 %v610_v59, %v2436_v3  ;;  %v636_v6 = vmul.f32 %v635_v61, %v2449_v43  ;;  %v647_v7 = vmul.f32 %v646_v62, %v2449_v43  ;;  %v1999_v49 = vor.u32 %v2140_v42, %v1996_v47  ;;  %1037 = vmatpush.bf16.msra.mxu2 %v1995_v46  ;;  %v2137_v59 = vld [vmem:[#allocation7 + $0xe4] sm:$0xf0] }
  0xed   :  { %v600_v36 = vmul.f32 %v599_v13, %v2436_v3  ;;  %v1871_v61 = vor.u32 %v2109_v51, %v1868_v57  ;;  %v1971_v62 = vor.u32 %v2137_v59, %v1970_v58  ;;  %v1922_v13 = vld [vmem:[#allocation7 + $0x70] sm:$0xf] }
  0xee   :  { %v612_v14 = vadd.f32 0.4994258, %v611_v1  ;;  %v637_v18 = vadd.f32 0.0036580483, %v636_v6  ;;  %v648_v19 = vadd.f32 0.014752088, %v647_v7  ;;  %1051 = vmatpush.bf16.msra.mxu3 %v1999_v49 }
  0xef   :  { %v601_v53 = vadd.f32 0.18741608, %v600_v36  ;;  %v1946_v1 = vld [vmem:[#allocation7 + $0xa0] sm:$0xf]  ;;  %v2128_v6 = vld [vmem:[#allocation7 + $0xa4] sm:$0xf]  ;;  %1028 = vmatpush.bf16.msra.mxu1 %v1871_v61 }
  0xf0   :  { %v613_v22 = vmul.f32 %v612_v14, %v2436_v3  ;;  %v649_v27 = vmul.f32 %v648_v19, %v2449_v43  ;;  %v638_v37 = vmul.f32 %v637_v18, %v2449_v43  ;;  %v1948_v7 = vld [vmem:[#allocation7 + $0xb8] sm:$0xf0]  ;;  %1038 = vmatpush.bf16.msra.mxu2 %v1971_v62  ;;  %v1947_v11 = vor.u32 %v2131_v5, %v1946_v1  ;;  %v2125_v14 = vld [vmem:[#allocation7 + $0x84] sm:$0xf0]  ;;  %v1924_v18 = vld [vmem:[#allocation7 + $0x88] sm:$0xf0] }
  0xf1   :  { %v1951_v12 = vor.u32 %v2128_v6, %v1948_v7  ;;  %v602_v19 = vmul.f32 %v601_v53, %v2436_v3  ;;  %v1923_v23 = vor.u32 %v2125_v14, %v1922_v13  ;;  %v1927_v26 = vor.u32 %v2122_v17, %v1924_v18 }
  0xf2   :  { %v2460_v33 = vadd.f32 1.0, %v613_v22  ;;  %v650_v38 = vadd.f32 0.112945676, %v649_v27  ;;  %v639_v54 = vadd.f32 0.05243302, %v638_v37  ;;  %1052 = vmatpush.bf16.msra.mxu3 %v1975_v4 }
  0xf3   :  { %v1898_v27 = vld [vmem:[#allocation7 + $0x40] sm:$0xf]  ;;  %v603_v32 = vadd.f32 1.1283791, %v602_v19 }
  0xf4   :  { %2169 = vrcp.f32 %v2460_v33  ;;  %v651_v44 = vmul.f32 %v650_v38, %v2449_v43  ;;  %v640_v9 = vmul.f32 %v639_v54, %v2449_v43  ;;  %v626_v20 = vand.u32 2147483648, %v2460_v33  ;;  %1039 = vmatpush.bf16.msra.mxu2 %v1947_v11 }
  0xf5   :  { %v624_v25 = vand.u32 2147483647, %v2460_v33  ;;  %vm620_vm1 = vweird.f32 %v2460_v33  ;;  %v1899_v37 = vor.u32 %v2119_v28, %v1898_v27  ;;  %v604_v46 = vmul.f32 %v603_v32, %v2432_v52 }
  0xf6   :  { %v652_v55 = vadd.f32 0.4994258, %v651_v44  ;;  %v641_v22 = vadd.f32 0.18741608, %v640_v9  ;;  %1053 = vmatpush.bf16.msra.mxu3 %v1951_v12  ;;  %v627_v35 = vor.u32 1.1754944e-38, %v626_v20 }
  0xf7   :  { %vm625_vm3 = vcmp.eq.f32.partialorder %v624_v25, 8.507059e+37  ;;  %v1876_v44 = vld [vmem:[#allocation7 + $0x28] sm:$0xf0] }
  0xf8   :  { %v653_v60 = vmul.f32 %v652_v55, %v2449_v43  ;;  %v642_v36 = vmul.f32 %v641_v22, %v2449_v43  ;;  %1040 = vmatpush.bf16.msra.mxu2 %v1923_v23 }
  0xfa   :  { %v2170_v2 = vpop.eup %2169  ;;  %v2469_v10 = vadd.f32 1.0, %v653_v60  ;;  %1054 = vmatpush.bf16.msra.mxu3 %v1927_v26  ;;  %v643_v48 = vadd.f32 1.1283791, %v642_v36 }
  0xfb   :  { %v616_v8 = vmul.f32 %v2170_v2, %v2460_v33  ;;  %vm621_vm0 = vweird.f32 %v2170_v2  ;;  %v2110_v33 = vld [vmem:[#allocation7 + $0x14] sm:$0xf] }
  0xfc   :  { %2171 = vrcp.f32 %v2469_v10  ;;  %vm622_vm2 = vmor %vm620_vm1, %vm621_vm0  ;;  %v664_v49 = vand.u32 2147483647, %v2469_v10  ;;  %v666_v43 = vand.u32 2147483648, %v2469_v10  ;;  %1041 = vmatpush.bf16.msra.mxu2 %v1899_v37  ;;  %v1879_v54 = vor.u32 %v2110_v33, %v1876_v44 }
  0xfd   :  { %v617_v16 = vsub.f32 1.0, %v616_v8  ;;  %vm660_vm5 = vweird.f32 %v2469_v10  ;;  %v644_v57 = vmul.f32 %v643_v48, %v2443_v24  ;;  %v2485_v24 = vld [vmem:[#allocation8] sm:$0x3f] }
  0xfe   :  { %1055 = vmatpush.bf16.msra.mxu3 %v1903_v39  ;;  %v667_v56 = vor.u32 1.1754944e-38, %v666_v43  ;;  %vm665_vm7 = vcmp.eq.f32.partialorder %v664_v49, 8.507059e+37  ;;  %v729_v6 = vperm.slane %v2485_v24, 2  ;;  %v730_v7 = vperm.slane %v2485_v24, 3 }
  0xff   :  { %v618_v21 = vmul.f32 %v2170_v2, %v617_v16  ;;  %v728_v11 = vperm.slane %v2485_v24, 1 }
 0x100   :  { %1042 = vmatpush.bf16.msra.mxu2 %v1875_v50 }
 0x101   :  { %v619_v29 = vadd.f32 %v2170_v2, %v618_v21 }
 0x102   :  { %v2172_v3 = vpop.eup %2171  ;;  %1056 = vmatpush.bf16.msra.mxu3 %v1879_v54 }
 0x103   :  { %v623_v34 = vsel %vm622_vm2, %v2170_v2, %v619_v29  ;;  %v656_v38 = vmul.f32 %v2172_v3, %v2469_v10  ;;  %vm661_vm4 = vweird.f32 %v2172_v3  ;;  %v727_v10 = vperm.slane %v2485_v24, 0 }
 0x104   :  { %v628_v42 = vsel %vm625_vm3, %v627_v35, %v623_v34  ;;  %vm662_vm6 = vmor %vm660_vm5, %vm661_vm4 }
 0x105   :  { %v657_v47 = vsub.f32 1.0, %v656_v38  ;;  %v629_v51 = vmul.f32 %v628_v42, %v604_v46 }
 0x107   :  { %v658_v53 = vmul.f32 %v2172_v3, %v657_v47  ;;  %v1854_v52 = vclamps-f32 %v629_v51, 1.0 }
 0x109   :  { %v659_v55 = vadd.f32 %v2172_v3, %v658_v53  ;;  %v672_v61 = vadd.f32 1.0, %v1854_v52 }
 0x10b   :  { %v663_v58 = vsel %vm662_vm6, %v2172_v3, %v659_v55  ;;  %v674_v2 = vmul.f32 %v672_v61, %v588_v63 }
 0x10c   :  { %v668_v59 = vsel %vm665_vm7, %v667_v56, %v663_v58 }
 0x10d   :  { %v669_v60 = vmul.f32 %v668_v59, %v644_v57 }
 0x10f   :  { %v1855_v62 = vclamps-f32 %v669_v60, 1.0 }
 0x111   :  { %v673_v1 = vadd.f32 1.0, %v1855_v62 }
 0x113   :  { %v675_v4 = vmul.f32 %v673_v1, %v589_v0 }
 0x115   :  { %v676_v5 = vpack.c.bf16 %v675_v4, %v674_v2 }
 0x117   :  { %987 = vmatmul.bf16.vlgmr.msrb.gmra.mxu2 %v676_v5  ;;  %1001 = vmatmul.bf16.vlgmr.msrb.gmra.mxu3 %v676_v5 }
 0x118   :  { %1015 = vmatmul.bf16.vlgmr.msra.gmra.mxu0 %v676_v5  ;;  %1029 = vmatmul.bf16.vlgmr.msra.gmra.mxu1 %v676_v5 }
 0x127   :  { %1043 = vmatmul.bf16.vlgmr.msra.gmra.mxu2 %v676_v5  ;;  %1057 = vmatmul.bf16.vlgmr.msra.gmra.mxu3 %v676_v5 }
 0x195   :  { %v1016_v8 = vpop.f32.mrf.mxu0  ;;  %v1030_v45 = vpop.f32.mrf.mxu1 }
 0x196   :  { %v2489_v9 = vadd.f32 %v1016_v8, %v729_v6  ;;  %v2493_v15 = vadd.f32 %v1030_v45, %v730_v7 }
 0x198   :  { %v2498_v12 = vmul.f32 0.70710677, %v2489_v9  ;;  %v2501_v13 = vmul.f32 0.70710677, %v2493_v15 }
 0x19a   :  { %v1167_v14 = vmul.f32 %v2498_v12, %v2498_v12  ;;  %v1207_v16 = vmul.f32 %v2501_v13, %v2501_v13  ;;  %v988_v17 = vpop.f32.mrf.mxu2  ;;  %v1002_v18 = vpop.f32.mrf.mxu3 }
 0x19b   :  { %v2509_v19 = vadd.f32 %v988_v17, %v727_v10  ;;  %v2513_v20 = vadd.f32 %v1002_v18, %v728_v11 }
 0x19c   :  { %v1168_v21 = vmin.f32 %v1167_v14, 16.0  ;;  %v1208_v22 = vmin.f32 %v1207_v16, 16.0 }
 0x19d   :  { %v2516_v23 = vmul.f32 0.70710677, %v2509_v19  ;;  %v2519_v25 = vmul.f32 0.70710677, %v2513_v20  ;;  %v1018_v49 = vpop.f32.mrf.mxu0 }
 0x19e   :  { %v1169_v26 = vmul.f32 2.1237322e-06, %v1168_v21  ;;  %v1180_v27 = vmul.f32 3.8918573e-05, %v1168_v21  ;;  %v1209_v28 = vmul.f32 2.1237322e-06, %v1208_v22  ;;  %v2534_v59 = vadd.f32 %v1018_v49, %v729_v6 }
 0x19f   :  { %v1220_v29 = vmul.f32 3.8918573e-05, %v1208_v22  ;;  %v1087_v30 = vmul.f32 %v2516_v23, %v2516_v23  ;;  %v1127_v31 = vmul.f32 %v2519_v25, %v2519_v25 }
 0x1a0   :  { %v1170_v32 = vadd.f32 0.00028619796, %v1169_v26  ;;  %v1181_v3 = vadd.f32 0.001143296, %v1180_v27  ;;  %v1210_v34 = vadd.f32 0.00028619796, %v1209_v28 }
 0x1a1   :  { %v1221_v35 = vadd.f32 0.001143296, %v1220_v29  ;;  %v2525_v36 = vmin.f32 %v1087_v30, 16.0  ;;  %v2527_v37 = vmin.f32 %v1127_v31, 16.0  ;;  %v2540_v17 = vmul.f32 0.70710677, %v2534_v59 }
 0x1a2   :  { %v1171_v38 = vmul.f32 %v1170_v32, %v1168_v21  ;;  %v1182_v39 = vmul.f32 %v1181_v3, %v1168_v21  ;;  %v1211_v40 = vmul.f32 %v1210_v34, %v1208_v22 }
 0x1a3   :  { %v1222_v41 = vmul.f32 %v1221_v35, %v1208_v22  ;;  %v1089_v42 = vmul.f32 2.1237322e-06, %v2525_v36  ;;  %v1100_v33 = vmul.f32 3.8918573e-05, %v2525_v36  ;;  %v1129_v44 = vmul.f32 2.1237322e-06, %v2527_v37 }
 0x1a4   :  { %v1172_v46 = vadd.f32 0.0036580483, %v1171_v38  ;;  %v1183_v47 = vadd.f32 0.014752088, %v1182_v39  ;;  %v1212_v48 = vadd.f32 0.0036580483, %v1211_v40 }
 0x1a5   :  { %v1223_v43 = vadd.f32 0.014752088, %v1222_v41  ;;  %v1090_v50 = vadd.f32 0.00028619796, %v1089_v42  ;;  %v1101_v51 = vadd.f32 0.001143296, %v1100_v33 }
 0x1a6   :  { %v1173_v53 = vmul.f32 %v1172_v46, %v1168_v21  ;;  %v1184_v54 = vmul.f32 %v1183_v47, %v1168_v21  ;;  %v1213_v55 = vmul.f32 %v1212_v48, %v1208_v22  ;;  %v1130_v56 = vadd.f32 0.00028619796, %v1129_v44  ;;  %v2550_v33 = vld [vmem:[#allocation10] sm:$0x3f]  ;;  %v1032_v47 = vpop.f32.mrf.mxu1 }
 0x1a7   :  { %v1224_v52 = vmul.f32 %v1223_v43, %v1208_v22  ;;  %v1091_v57 = vmul.f32 %v1090_v50, %v2525_v36  ;;  %v1102_v58 = vmul.f32 %v1101_v51, %v2525_v36  ;;  %v1140_v8 = vmul.f32 3.8918573e-05, %v2527_v37  ;;  %v990_v51 = vpop.f32.mrf.mxu2 }
 0x1a8   :  { %v1174_v60 = vadd.f32 0.05243302, %v1173_v53  ;;  %v1185_v61 = vadd.f32 0.112945676, %v1184_v54  ;;  %v1214_v62 = vadd.f32 0.05243302, %v1213_v55  ;;  %v1131_v1 = vmul.f32 %v1130_v56, %v2527_v37 }
 0x1a9   :  { %v1225_v63 = vadd.f32 0.112945676, %v1224_v52  ;;  %v1092_v0 = vadd.f32 0.0036580483, %v1091_v57  ;;  %v1103_v16 = vadd.f32 0.014752088, %v1102_v58  ;;  %v2570_v56 = vadd.f32 %v1032_v47, %v730_v7 }
 0x1aa   :  { %v1175_v2 = vmul.f32 %v1174_v60, %v1168_v21  ;;  %v1186_v4 = vmul.f32 %v1185_v61, %v1168_v21  ;;  %v1215_v5 = vmul.f32 %v1214_v62, %v1208_v22  ;;  %v1132_v30 = vadd.f32 0.0036580483, %v1131_v1 }
 0x1ab   :  { %v1226_v45 = vmul.f32 %v1225_v63, %v1208_v22  ;;  %v1093_v14 = vmul.f32 %v1092_v0, %v2525_v36  ;;  %v1104_v29 = vmul.f32 %v1103_v16, %v2525_v36  ;;  %v1141_v34 = vadd.f32 0.001143296, %v1140_v8 }
 0x1ac   :  { %v1176_v6 = vadd.f32 0.18741608, %v1175_v2  ;;  %v1187_v18 = vadd.f32 0.4994258, %v1186_v4  ;;  %v1216_v26 = vadd.f32 0.18741608, %v1215_v5  ;;  %v1133_v40 = vmul.f32 %v1132_v30, %v2527_v37 }
 0x1ad   :  { %v1227_v27 = vadd.f32 0.4994258, %v1226_v45  ;;  %v1094_v28 = vadd.f32 0.05243302, %v1093_v14  ;;  %v1105_v39 = vadd.f32 0.112945676, %v1104_v29  ;;  %v1142_v49 = vmul.f32 %v1141_v34, %v2527_v37 }
 0x1ae   :  { %v1177_v31 = vmul.f32 %v1176_v6, %v1168_v21  ;;  %v1188_v32 = vmul.f32 %v1187_v18, %v1168_v21  ;;  %v1217_v3 = vmul.f32 %v1216_v26, %v1208_v22  ;;  %v2548_v42 = vmul.f32 0.5, %v2489_v9 }
 0x1af   :  { %v1228_v35 = vmul.f32 %v1227_v27, %v1208_v22  ;;  %v1095_v38 = vmul.f32 %v1094_v28, %v2525_v36  ;;  %v1106_v21 = vmul.f32 %v1105_v39, %v2525_v36  ;;  %v1134_v22 = vadd.f32 0.05243302, %v1133_v40 }
 0x1b0   :  { %v2545_v41 = vadd.f32 1.0, %v1188_v32  ;;  %v1178_v48 = vadd.f32 1.1283791, %v1177_v31  ;;  %v2558_v43 = vmul.f32 0.5, %v2493_v15  ;;  %v1218_v50 = vadd.f32 1.1283791, %v1217_v3 }
 0x1b1   :  { %v2552_v44 = vadd.f32 1.0, %v1228_v35  ;;  %v1096_v46 = vadd.f32 0.18741608, %v1095_v38  ;;  %v1407_v9 = vmul.f32 %v2540_v17, %v2540_v17  ;;  %v1595_v53 = vperm.slane %v2550_v33, 2 }
 0x1b2   :  { %2173 = vrcp.f32 %v2545_v41  ;;  %v1596_v54 = vperm.slane %v2550_v33, 3  ;;  %v2566_v55 = vmul.f32 0.5, %v2509_v19  ;;  %v1199_v15 = vand.u32 2147483647, %v2545_v41 }
 0x1b3   :  { %2175 = vrcp.f32 %v2552_v44  ;;  %v1201_v52 = vand.u32 2147483648, %v2545_v41  ;;  %v1097_v57 = vmul.f32 %v1096_v46, %v2525_v36  ;;  %v1107_v58 = vadd.f32 0.4994258, %v1106_v21 }
 0x1b4   :  { %v1179_v60 = vmul.f32 %v1178_v48, %v2498_v12  ;;  %v1135_v61 = vmul.f32 %v1134_v22, %v2527_v37  ;;  %v1143_v62 = vadd.f32 0.014752088, %v1142_v49  ;;  %v2579_v19 = vadd.f32 %v990_v51, %v727_v10 }
 0x1b5   :  { %vm1195_vm8 = vweird.f32 %v2545_v41  ;;  %v1219_v7 = vmul.f32 %v1218_v50, %v2501_v13  ;;  %v1108_v63 = vmul.f32 %v1107_v58, %v2525_v36  ;;  %v2584_v0 = vmin.f32 %v1407_v9, 16.0 }
 0x1b6   :  { %vm1235_vm9 = vweird.f32 %v2552_v44  ;;  %v1239_v12 = vand.u32 2147483647, %v2552_v44  ;;  %v1241_v2 = vand.u32 2147483648, %v2552_v44  ;;  %v1144_v4 = vmul.f32 %v1143_v62, %v2527_v37 }
 0x1b7   :  { %vm2591_vm10 = vcmp.eq.f32.partialorder %v1199_v15, 8.507059e+37  ;;  %v1202_v13 = vor.u32 1.1754944e-38, %v1201_v52  ;;  %v1098_v36 = vadd.f32 1.1283791, %v1097_v57  ;;  %v2595_v45 = vadd.f32 1.0, %v1108_v63 }
 0x1b8   :  { %v2174_v1 = vpop.eup %2173  ;;  %v1136_v16 = vadd.f32 0.18741608, %v1135_v61  ;;  %v1145_v6 = vadd.f32 0.112945676, %v1144_v4  ;;  %v1409_v18 = vmul.f32 2.1237322e-06, %v2584_v0 }
 0x1b9   :  { %v2176_v5 = vpop.eup %2175  ;;  %v1191_v10 = vmul.f32 %v2174_v1, %v2545_v41  ;;  %2177 = vrcp.f32 %v2595_v45  ;;  %v1593_v27 = vperm.slane %v2550_v33, 0  ;;  %v2602_v28 = vmul.f32 0.70710677, %v2570_v56 }
 0x1ba   :  { %v1231_v14 = vmul.f32 %v2176_v5, %v2552_v44  ;;  %vm2604_vm11 = vcmp.eq.f32.partialorder %v1239_v12, 8.507059e+37  ;;  %v1242_v31 = vor.u32 1.1754944e-38, %v1241_v2  ;;  %v1146_v32 = vmul.f32 %v1145_v6, %v2527_v37 }
 0x1bb   :  { %v1192_v26 = vsub.f32 1.0, %v1191_v10  ;;  %vm1196_vm12 = vweird.f32 %v2174_v1  ;;  %v2610_v34 = vmul.f32 %v1098_v36, %v2516_v23  ;;  %v1410_v35 = vadd.f32 0.00028619796, %v1409_v18 }
 0x1bc   :  { %v1232_v29 = vsub.f32 1.0, %v1231_v14  ;;  %vm1236_vm13 = vweird.f32 %v2176_v5  ;;  %v1137_v39 = vmul.f32 %v1136_v16, %v2527_v37  ;;  %v1147_v40 = vadd.f32 0.4994258, %v1146_v32  ;;  %vm1197_vm14 = vmor %vm1195_vm8, %vm1196_vm12 }
 0x1bd   :  { %v1193_v3 = vmul.f32 %v2174_v1, %v1192_v26  ;;  %v1411_v21 = vmul.f32 %v1410_v35, %v2584_v0  ;;  %v1420_v47 = vmul.f32 3.8918573e-05, %v2584_v0  ;;  %v1447_v48 = vmul.f32 %v2602_v28, %v2602_v28  ;;  %vm1237_vm0 = vmor %vm1235_vm9, %vm1236_vm13 }
 0x1be   :  { %v1233_v38 = vmul.f32 %v2176_v5, %v1232_v29  ;;  %vm1115_vm15 = vweird.f32 %v2595_v45  ;;  %v1119_v23 = vand.u32 2147483647, %v2595_v45  ;;  %v1121_v49 = vand.u32 2147483648, %v2595_v45 }
 0x1bf   :  { %v1194_v46 = vadd.f32 %v2174_v1, %v1193_v3  ;;  %v1148_v50 = vmul.f32 %v1147_v40, %v2527_v37  ;;  %v2178_v9 = vpop.eup %2177  ;;  %v1412_v15 = vadd.f32 0.0036580483, %v1411_v21  ;;  %v1421_v52 = vadd.f32 0.001143296, %v1420_v47 }
 0x1c0   :  { %v1234_v22 = vadd.f32 %v2176_v5, %v1233_v38  ;;  %v2626_v57 = vmin.f32 %v1447_v48, 16.0  ;;  %v1111_v61 = vmul.f32 %v2178_v9, %v2595_v45  ;;  %v1138_v62 = vadd.f32 1.1283791, %v1137_v39 }
 0x1c1   :  { %v1198_v51 = vsel %vm1197_vm14, %v2174_v1, %v1194_v46  ;;  %v2633_v1 = vadd.f32 1.0, %v1148_v50  ;;  %v1413_v44 = vmul.f32 %v1412_v15, %v2584_v0  ;;  %v1422_v4 = vmul.f32 %v1421_v52, %v2584_v0  ;;  %v2197_v50 = vld [vmem:[#allocation2 + $0x10] sm:$0xff] }
 0x1c2   :  { %v1203_v41 = vsel %vm2591_vm10, %v1202_v13, %v1198_v51  ;;  %v1238_v58 = vsel %vm1237_vm0, %v2176_v5, %v1234_v22  ;;  %v1112_v2 = vsub.f32 1.0, %v1111_v61  ;;  %v1449_v10 = vmul.f32 2.1237322e-06, %v2626_v57 }
 0x1c3   :  { %v1204_v63 = vmul.f32 %v1203_v41, %v1179_v60  ;;  %v1243_v37 = vsel %vm2604_vm11, %v1242_v31, %v1238_v58  ;;  %vm2638_vm1 = vcmp.eq.f32.partialorder %v1119_v23, 8.507059e+37  ;;  %2179 = vrcp.f32 %v2633_v1  ;;  %v2198_v41 = vld [vmem:[#allocation2 + $0x18] sm:$0xff] }
 0x1c4   :  { %v1244_v12 = vmul.f32 %v1243_v37, %v1219_v7  ;;  %v2644_v60 = vmul.f32 0.70710677, %v2579_v19  ;;  %v1113_v36 = vmul.f32 %v2178_v9, %v1112_v2  ;;  %vm1116_vm2 = vweird.f32 %v2178_v9 }
 0x1c5   :  { %v2050_v8 = vclamps-f32 %v1204_v63, 1.0  ;;  %v1414_v14 = vadd.f32 0.05243302, %v1413_v44  ;;  %v1122_v16 = vor.u32 1.1754944e-38, %v1121_v49  ;;  %v1423_v6 = vadd.f32 0.014752088, %v1422_v4  ;;  %vm1117_vm3 = vmor %vm1115_vm15, %vm1116_vm2 }
 0x1c6   :  { %v2051_v13 = vclamps-f32 %v1244_v12, 1.0  ;;  %v1450_v18 = vadd.f32 0.00028619796, %v1449_v10  ;;  %v1114_v29 = vadd.f32 %v2178_v9, %v1113_v36  ;;  %v2647_v30 = vmul.f32 %v1138_v62, %v2519_v25 }
 0x1c7   :  { %v1569_v7 = vadd.f32 1.0, %v2050_v8  ;;  %v1415_v31 = vmul.f32 %v1414_v14, %v2584_v0  ;;  %v1424_v3 = vmul.f32 %v1423_v6, %v2584_v0  ;;  %v1460_v38 = vmul.f32 3.8918573e-05, %v2626_v57 }
 0x1c8   :  { %v1570_v26 = vadd.f32 1.0, %v2051_v13  ;;  %v1451_v35 = vmul.f32 %v1450_v18, %v2626_v57  ;;  %v1118_v40 = vsel %vm1117_vm3, %v2178_v9, %v1114_v29  ;;  %vm1155_vm4 = vweird.f32 %v2633_v1  ;;  %v1004_v18 = vpop.f32.mrf.mxu3 }
 0x1c9   :  { %v1581_v32 = vmul.f32 %v1569_v7, %v2548_v42  ;;  %v1416_v25 = vadd.f32 0.18741608, %v1415_v31  ;;  %v1327_v46 = vmul.f32 %v2644_v60, %v2644_v60  ;;  %v2180_v21 = vpop.eup %2179  ;;  %v1123_v45 = vsel %vm2638_vm1, %v1122_v16, %v1118_v40 }
 0x1ca   :  { %v1582_v39 = vmul.f32 %v1570_v26, %v2558_v43  ;;  %v1425_v47 = vadd.f32 0.112945676, %v1424_v3  ;;  %v1452_v48 = vadd.f32 0.0036580483, %v1451_v35  ;;  %v1124_v43 = vmul.f32 %v1123_v45, %v2610_v34 }
 0x1cb   :  { %v1607_v42 = vmul.f32 %v1595_v53, %v1581_v32  ;;  %v1151_v23 = vmul.f32 %v2180_v21, %v2633_v1  ;;  %v1159_v49 = vand.u32 2147483647, %v2633_v1  ;;  %v1417_v51 = vmul.f32 %v1416_v25, %v2584_v0 }
 0x1cc   :  { %v1608_v22 = vmul.f32 %v1596_v54, %v1582_v39  ;;  %v1426_v15 = vmul.f32 %v1425_v47, %v2584_v0  ;;  %v1453_v52 = vmul.f32 %v1452_v48, %v2626_v57  ;;  %v2048_v61 = vclamps-f32 %v1124_v43, 1.0  ;;  %v2199_v39 = vld [vmem:[#allocation2] sm:$0xff]  ;;  %v1044_v48 = vpop.f32.mrf.mxu2 }
 0x1cd   :  { %v1619_v9 = vadd.f32 %v2197_v50, %v1607_v42  ;;  %v1152_v62 = vsub.f32 1.0, %v1151_v23  ;;  %v1461_v63 = vadd.f32 0.001143296, %v1460_v38  ;;  %vm1156_vm5 = vweird.f32 %v2180_v21 }
 0x1ce   :  { %v1620_v58 = vadd.f32 %v2198_v41, %v1608_v22  ;;  %v1161_v34 = vand.u32 2147483648, %v2633_v1  ;;  %v1427_v37 = vadd.f32 0.4994258, %v1426_v15  ;;  %v2673_v44 = vmin.f32 %v1327_v46, 16.0  ;;  %vm1157_vm7 = vmor %vm1155_vm4, %vm1156_vm5 }
 0x1cf   :  { %1631 = vst [vmem:[#allocation11 + $0x10] sm:$0xff] %v1619_v9  ;;  %v1567_v12 = vadd.f32 1.0, %v2048_v61  ;;  %v1153_v2 = vmul.f32 %v2180_v21, %v1152_v62  ;;  %v1454_v4 = vadd.f32 0.05243302, %v1453_v52  ;;  %v1462_v10 = vmul.f32 %v1461_v63, %v2626_v57 }
 0x1d0   :  { %1632 = vst [vmem:[#allocation11 + $0x18] sm:$0xff] %v1620_v58  ;;  %vm2676_vm6 = vcmp.eq.f32.partialorder %v1159_v49, 8.507059e+37  ;;  %v1428_v5 = vmul.f32 %v1427_v37, %v2584_v0  ;;  %v1329_v13 = vmul.f32 2.1237322e-06, %v2673_v44  ;;  %v1340_v36 = vmul.f32 3.8918573e-05, %v2673_v44 }
 0x1d1   :  { %v1579_v14 = vmul.f32 %v1567_v12, %v2566_v55  ;;  %v1154_v7 = vadd.f32 %v2180_v21, %v1153_v2  ;;  %v1418_v16 = vadd.f32 1.1283791, %v1417_v51  ;;  %v1463_v6 = vadd.f32 0.014752088, %v1462_v10 }
 0x1d2   :  { %v1162_v26 = vor.u32 1.1754944e-38, %v1161_v34  ;;  %v2687_v29 = vadd.f32 1.0, %v1428_v5  ;;  %v1330_v31 = vadd.f32 0.00028619796, %v1329_v13  ;;  %v1341_v32 = vadd.f32 0.001143296, %v1340_v36 }
 0x1d3   :  { %v1605_v0 = vmul.f32 %v1593_v27, %v1579_v14  ;;  %v1158_v3 = vsel %vm1157_vm7, %v2180_v21, %v1154_v7  ;;  %v1455_v35 = vmul.f32 %v1454_v4, %v2626_v57  ;;  %v1464_v55 = vmul.f32 %v1463_v6, %v2626_v57 }
 0x1d4   :  { %v1163_v38 = vsel %vm2676_vm6, %v1162_v26, %v1158_v3  ;;  %2181 = vrcp.f32 %v2687_v29  ;;  %v2698_v1 = vadd.f32 %v1004_v18, %v728_v11  ;;  %v1064_v25 = vmul.f32 0.5, %v2513_v20 }
 0x1d5   :  { %v1617_v40 = vadd.f32 %v2199_v39, %v1605_v0  ;;  %v1164_v46 = vmul.f32 %v1163_v38, %v2647_v30  ;;  %v1594_v21 = vperm.slane %v2550_v33, 1  ;;  %v1465_v42 = vadd.f32 0.112945676, %v1464_v55 }
 0x1d6   :  { %v1331_v45 = vmul.f32 %v1330_v31, %v2673_v44  ;;  %v1342_v47 = vmul.f32 %v1341_v32, %v2673_v44  ;;  %v1419_v43 = vmul.f32 %v1418_v16, %v2540_v17  ;;  %v1456_v11 = vadd.f32 0.18741608, %v1455_v35  ;;  %v2200_v16 = vld [vmem:[#allocation2 + $0x8] sm:$0xff] }
 0x1d7   :  { %1629 = vst [vmem:[#allocation11] sm:$0xff] %v1617_v40  ;;  %v2049_v22 = vclamps-f32 %v1164_v46, 1.0  ;;  %v731_v23 = vperm.slane %v2485_v24, 4  ;;  %v1466_v49 = vmul.f32 %v1465_v42, %v2626_v57  ;;  %v2709_v30 = vmul.f32 0.70710677, %v2698_v1 }
 0x1d8   :  { %v1332_v20 = vadd.f32 0.0036580483, %v1331_v45  ;;  %v1343_v50 = vadd.f32 0.014752088, %v1342_v47  ;;  %vm1435_vm8 = vweird.f32 %v2687_v29  ;;  %v1439_v51 = vand.u32 2147483647, %v2687_v29 }
 0x1d9   :  { %v1568_v9 = vadd.f32 1.0, %v2049_v22  ;;  %v2715_v15 = vadd.f32 %v1044_v48, %v731_v23  ;;  %v1467_v52 = vadd.f32 0.4994258, %v1466_v49  ;;  %v1367_v61 = vmul.f32 %v2709_v30, %v2709_v30 }
 0x1da   :  { %v2182_v17 = vpop.eup %2181  ;;  %v1333_v41 = vmul.f32 %v1332_v20, %v2673_v44  ;;  %v1344_v58 = vmul.f32 %v1343_v50, %v2673_v44  ;;  %v1441_v34 = vand.u32 2147483648, %v2687_v29  ;;  %v1457_v37 = vmul.f32 %v1456_v11, %v2626_v57  ;;  %v1058_v50 = vpop.f32.mrf.mxu3 }
 0x1db   :  { %v1580_v62 = vmul.f32 %v1568_v9, %v1064_v25  ;;  %v1431_v63 = vmul.f32 %v2182_v17, %v2687_v29  ;;  %v1468_v12 = vmul.f32 %v1467_v52, %v2626_v57  ;;  %v2725_v10 = vmin.f32 %v1367_v61, 16.0 }
 0x1dc   :  { %v1334_v2 = vadd.f32 0.05243302, %v1333_v41  ;;  %v1345_v4 = vadd.f32 0.112945676, %v1344_v58  ;;  %vm1436_vm9 = vweird.f32 %v2182_v17  ;;  %v2730_v13 = vmul.f32 0.70710677, %v2715_v15 }
 0x1dd   :  { %v1606_v8 = vmul.f32 %v1594_v21, %v1580_v62  ;;  %v1432_v5 = vsub.f32 1.0, %v1431_v63  ;;  %v2732_v36 = vadd.f32 1.0, %v1468_v12  ;;  %v1369_v57 = vmul.f32 2.1237322e-06, %v2725_v10  ;;  %vm1437_vm11 = vmor %vm1435_vm8, %vm1436_vm9 }
 0x1de   :  { %v1335_v14 = vmul.f32 %v1334_v2, %v2673_v44  ;;  %v1346_v7 = vmul.f32 %v1345_v4, %v2673_v44  ;;  %v1380_v26 = vmul.f32 3.8918573e-05, %v2725_v10  ;;  %v1247_v31 = vmul.f32 %v2730_v13, %v2730_v13  ;;  %v1046_v2 = vpop.f32.mrf.mxu2 }
 0x1df   :  { %v1618_v6 = vadd.f32 %v2200_v16, %v1606_v8  ;;  %v1433_v18 = vmul.f32 %v2182_v17, %v1432_v5  ;;  %vm2740_vm10 = vcmp.eq.f32.partialorder %v1439_v51, 8.507059e+37  ;;  %v1442_v0 = vor.u32 1.1754944e-38, %v1441_v34 }
 0x1e0   :  { %v1458_v3 = vadd.f32 1.1283791, %v1457_v37  ;;  %2183 = vrcp.f32 %v2732_v36  ;;  %v1479_v55 = vand.u32 2147483647, %v2732_v36  ;;  %v1347_v38 = vadd.f32 0.4994258, %v1346_v7 }
 0x1e1   :  { %1630 = vst [vmem:[#allocation11 + $0x8] sm:$0xff] %v1618_v6  ;;  %v1434_v35 = vadd.f32 %v2182_v17, %v1433_v18  ;;  %v2746_v39 = vmin.f32 %v1247_v31, 16.0  ;;  %v1481_v40 = vand.u32 2147483648, %v2732_v36  ;;  %v1370_v25 = vadd.f32 0.00028619796, %v1369_v57 }
 0x1e2   :  { %v1381_v46 = vadd.f32 0.001143296, %v1380_v26  ;;  %v732_v42 = vperm.slane %v2485_v24, 5  ;;  %v1336_v47 = vadd.f32 0.18741608, %v1335_v14  ;;  %v1348_v48 = vmul.f32 %v1347_v38, %v2673_v44 }
 0x1e3   :  { %v1438_v45 = vsel %vm1437_vm11, %v2182_v17, %v1434_v35  ;;  %v1249_v22 = vmul.f32 2.1237322e-06, %v2746_v39  ;;  %v1371_v49 = vmul.f32 %v1370_v25, %v2725_v10  ;;  %v1260_v20 = vmul.f32 3.8918573e-05, %v2746_v39 }
 0x1e4   :  { %v1443_v11 = vsel %vm2740_vm10, %v1442_v0, %v1438_v45  ;;  %v1382_v29 = vmul.f32 %v1381_v46, %v2725_v10  ;;  %v1071_v9 = vmul.f32 0.5, %v2534_v59  ;;  %v2761_v52 = vadd.f32 1.0, %v1348_v48  ;;  %v2201_v45 = vld [vmem:[#allocation2 + $0x40] sm:$0xff] }
 0x1e5   :  { %v1444_v51 = vmul.f32 %v1443_v11, %v1419_v43  ;;  %v1250_v17 = vadd.f32 0.00028619796, %v1249_v22  ;;  %v1372_v58 = vadd.f32 0.0036580483, %v1371_v49  ;;  %v1261_v62 = vadd.f32 0.001143296, %v1260_v20 }
 0x1e6   :  { %v2184_v41 = vpop.eup %2183  ;;  %v1383_v61 = vadd.f32 0.014752088, %v1382_v29  ;;  %v1459_v34 = vmul.f32 %v1458_v3, %v2602_v28  ;;  %v2767_v12 = vadd.f32 %v1058_v50, %v732_v42  ;;  %vm2769_vm12 = vcmp.eq.f32.partialorder %v1479_v55, 8.507059e+37 }
 0x1e7   :  { %v2056_v63 = vclamps-f32 %v1444_v51, 1.0  ;;  %v1471_v37 = vmul.f32 %v2184_v41, %v2732_v36  ;;  %v1482_v43 = vor.u32 1.1754944e-38, %v1481_v40  ;;  %v1337_v4 = vmul.f32 %v1336_v47, %v2673_v44 }
 0x1e8   :  { %2185 = vrcp.f32 %v2761_v52  ;;  %v1373_v28 = vmul.f32 %v1372_v58, %v2725_v10  ;;  %v1384_v14 = vmul.f32 %v1383_v61, %v2725_v10  ;;  %vm1476_vm13 = vweird.f32 %v2184_v41 }
 0x1e9   :  { %v1575_v8 = vadd.f32 1.0, %v2056_v63  ;;  %v1472_v5 = vsub.f32 1.0, %v1471_v37  ;;  %v1251_v7 = vmul.f32 %v1250_v17, %v2746_v39  ;;  %v1262_v57 = vmul.f32 %v1261_v62, %v2746_v39 }
 0x1ea   :  { %v2781_v16 = vadd.f32 %v1046_v2, %v731_v23  ;;  %v1374_v44 = vadd.f32 0.05243302, %v1373_v28  ;;  %v1385_v26 = vadd.f32 0.112945676, %v1384_v14  ;;  %vm1475_vm14 = vweird.f32 %v2732_v36 }
 0x1eb   :  { %v1587_v6 = vmul.f32 %v1575_v8, %v1071_v9  ;;  %v1473_v18 = vmul.f32 %v2184_v41, %v1472_v5  ;;  %v1338_v31 = vadd.f32 1.1283791, %v1337_v4  ;;  %v1252_v32 = vadd.f32 0.0036580483, %v1251_v7  ;;  %vm1477_vm15 = vmor %vm1475_vm14, %vm1476_vm13 }
 0x1ec   :  { %v1263_v0 = vadd.f32 0.014752088, %v1262_v57  ;;  %v1375_v55 = vmul.f32 %v1374_v44, %v2725_v10  ;;  %v1386_v38 = vmul.f32 %v1385_v26, %v2725_v10  ;;  %v1359_v23 = vand.u32 2147483647, %v2761_v52 }
 0x1ed   :  { %v1613_v3 = vmul.f32 %v1595_v53, %v1587_v6  ;;  %v1474_v35 = vadd.f32 %v2184_v41, %v1473_v18  ;;  %v1253_v25 = vmul.f32 %v1252_v32, %v2746_v39  ;;  %v2793_v46 = vmul.f32 0.70710677, %v2767_v12  ;;  %v1060_v32 = vpop.f32.mrf.mxu3 }
 0x1ee   :  { %v2186_v40 = vpop.eup %2185  ;;  %v1264_v36 = vmul.f32 %v1263_v0, %v2746_v39  ;;  %v2797_v22 = vmul.f32 0.70710677, %v2781_v16  ;;  %v1376_v49 = vadd.f32 0.18741608, %v1375_v55  ;;  %v1387_v29 = vadd.f32 0.4994258, %v1386_v38 }
 0x1ef   :  { %v1625_v47 = vadd.f32 %v2201_v45, %v1613_v3  ;;  %v1478_v53 = vsel %vm1477_vm15, %v2184_v41, %v1474_v35  ;;  %v1351_v48 = vmul.f32 %v2186_v40, %v2761_v52  ;;  %v1254_v20 = vadd.f32 0.05243302, %v1253_v25  ;;  %v2202_v38 = vld [vmem:[#allocation2 + $0x48] sm:$0xff] }
 0x1f0   :  { %v1483_v11 = vsel %vm2769_vm12, %v1482_v43, %v1478_v53  ;;  %v1265_v51 = vadd.f32 0.112945676, %v1264_v36  ;;  %v1287_v17 = vmul.f32 %v2793_v46, %v2793_v46  ;;  %vm1356_vm0 = vweird.f32 %v2186_v40 }
 0x1f1   :  { %1637 = vst [vmem:[#allocation11 + $0x40] sm:$0xff] %v1625_v47  ;;  %v1484_v50 = vmul.f32 %v1483_v11, %v1459_v34  ;;  %v1352_v9 = vsub.f32 1.0, %v1351_v48  ;;  %v1361_v41 = vand.u32 2147483648, %v2761_v52  ;;  %v1388_v58 = vmul.f32 %v1387_v29, %v2725_v10 }
 0x1f2   :  { %v1255_v61 = vmul.f32 %v1254_v20, %v2746_v39  ;;  %v1266_v37 = vmul.f32 %v1265_v51, %v2746_v39  ;;  %v1487_v2 = vmul.f32 %v2797_v22, %v2797_v22  ;;  %v1072_v34 = vmul.f32 0.5, %v2570_v56 }
 0x1f3   :  { %v2057_v62 = vclamps-f32 %v1484_v50, 1.0  ;;  %v1353_v63 = vmul.f32 %v2186_v40, %v1352_v9  ;;  %v1377_v59 = vmul.f32 %v1376_v49, %v2725_v10  ;;  %v2811_v43 = vadd.f32 1.0, %v1388_v58 }
 0x1f4   :  { %v2813_v4 = vmin.f32 %v1287_v17, 16.0  ;;  %vm1355_vm1 = vweird.f32 %v2761_v52  ;;  %v1267_v28 = vadd.f32 0.4994258, %v1266_v37  ;;  %v1339_v14 = vmul.f32 %v1338_v31, %v2644_v60 }
 0x1f5   :  { %v1576_v8 = vadd.f32 1.0, %v2057_v62  ;;  %v1354_v5 = vadd.f32 %v2186_v40, %v1353_v63  ;;  %vm1357_vm2 = vmor %vm1355_vm1, %vm1356_vm0  ;;  %vm1360_vm3 = vcmp.eq.f32.partialorder %v1359_v23, 8.507059e+37  ;;  %v1362_v7 = vor.u32 1.1754944e-38, %v1361_v41 }
 0x1f6   :  { %2187 = vrcp.f32 %v2811_v43  ;;  %v1256_v10 = vadd.f32 0.18741608, %v1255_v61  ;;  %v2819_v6 = vmin.f32 %v1487_v2, 16.0  ;;  %v1378_v44 = vadd.f32 1.1283791, %v1377_v59  ;;  %v2203_v59 = vld [vmem:[#allocation2 + $0x30] sm:$0xff] }
 0x1f7   :  { %v1588_v56 = vmul.f32 %v1576_v8, %v1072_v34  ;;  %v1358_v57 = vsel %vm1357_vm2, %v2186_v40, %v1354_v5  ;;  %v1268_v26 = vmul.f32 %v1267_v28, %v2746_v39  ;;  %v1289_v52 = vmul.f32 2.1237322e-06, %v2813_v4 }
 0x1f8   :  { %v1363_v18 = vsel %vm1360_vm3, %v1362_v7, %v1358_v57  ;;  %v1069_v0 = vmul.f32 0.5, %v2579_v19  ;;  %v1300_v55 = vmul.f32 3.8918573e-05, %v2813_v4  ;;  %v1257_v25 = vmul.f32 %v1256_v10, %v2746_v39 }
 0x1f9   :  { %v1614_v60 = vmul.f32 %v1596_v54, %v1588_v56  ;;  %v1364_v31 = vmul.f32 %v1363_v18, %v1339_v14  ;;  %v2826_v3 = vadd.f32 1.0, %v1268_v26  ;;  %v1290_v35 = vadd.f32 0.00028619796, %v1289_v52 }
 0x1fa   :  { %v1489_v36 = vmul.f32 2.1237322e-06, %v2819_v6  ;;  %v2832_v47 = vmul.f32 0.5, %v2698_v1  ;;  %v1379_v54 = vmul.f32 %v1378_v44, %v2709_v30  ;;  %v2838_v19 = vadd.f32 %v1060_v32, %v732_v42 }
 0x1fb   :  { %v1626_v40 = vadd.f32 %v2202_v38, %v1614_v60  ;;  %v2054_v23 = vclamps-f32 %v1364_v31, 1.0  ;;  %2189 = vrcp.f32 %v2826_v3  ;;  %v1399_v39 = vand.u32 2147483647, %v2811_v43 }
 0x1fc   :  { %v2188_v45 = vpop.eup %2187  ;;  %v1291_v11 = vmul.f32 %v1290_v35, %v2813_v4  ;;  %vm1395_vm4 = vweird.f32 %v2811_v43  ;;  %v1401_v1 = vand.u32 2147483648, %v2811_v43  ;;  %v1301_v49 = vadd.f32 0.001143296, %v1300_v55 }
 0x1fd   :  { %1638 = vst [vmem:[#allocation11 + $0x48] sm:$0xff] %v1626_v40  ;;  %v1573_v53 = vadd.f32 1.0, %v2054_v23  ;;  %v1391_v48 = vmul.f32 %v2188_v45, %v2811_v43  ;;  %v1490_v30 = vadd.f32 0.00028619796, %v1489_v36  ;;  %v1258_v50 = vadd.f32 1.1283791, %v1257_v25 }
 0x1fe   :  { %v1500_v24 = vmul.f32 3.8918573e-05, %v2819_v6  ;;  %v1292_v42 = vadd.f32 0.0036580483, %v1291_v11  ;;  %v1302_v9 = vmul.f32 %v1301_v49, %v2813_v4  ;;  %v2849_v17 = vmul.f32 0.70710677, %v2838_v19 }
 0x1ff   :  { %v1585_v29 = vmul.f32 %v1573_v53, %v1069_v0  ;;  %v1392_v20 = vsub.f32 1.0, %v1391_v48  ;;  %v1491_v51 = vmul.f32 %v1490_v30, %v2819_v6  ;;  %vm1396_vm5 = vweird.f32 %v2188_v45 }
 0x200   :  { %v1501_v61 = vadd.f32 0.001143296, %v1500_v24  ;;  %vm2853_vm6 = vcmp.eq.f32.partialorder %v1399_v39, 8.507059e+37  ;;  %v1402_v37 = vor.u32 1.1754944e-38, %v1401_v1  ;;  %v1303_v2 = vadd.f32 0.014752088, %v1302_v9  ;;  %vm1397_vm7 = vmor %vm1395_vm4, %vm1396_vm5 }
 0x201   :  { %v1611_v41 = vmul.f32 %v1593_v27, %v1585_v29  ;;  %v1393_v58 = vmul.f32 %v2188_v45, %v1392_v20  ;;  %v2190_v62 = vpop.eup %2189  ;;  %v1527_v34 = vmul.f32 %v2849_v17, %v2849_v17  ;;  %v1259_v28 = vmul.f32 %v1258_v50, %v2730_v13 }
 0x202   :  { %v1271_v27 = vmul.f32 %v2190_v62, %v2826_v3  ;;  %v1293_v14 = vmul.f32 %v1292_v42, %v2813_v4  ;;  %v1304_v7 = vmul.f32 %v1303_v2, %v2813_v4  ;;  %v1492_v56 = vadd.f32 0.0036580483, %v1491_v51 }
 0x203   :  { %v1623_v8 = vadd.f32 %v2203_v59, %v1611_v41  ;;  %v1394_v5 = vadd.f32 %v2188_v45, %v1393_v58  ;;  %v1502_v57 = vmul.f32 %v1501_v61, %v2819_v6  ;;  %vm1275_vm8 = vweird.f32 %v2826_v3 }
 0x204   :  { %v1272_v18 = vsub.f32 1.0, %v1271_v27  ;;  %v2867_v44 = vmin.f32 %v1527_v34, 16.0  ;;  %v1279_v43 = vand.u32 2147483647, %v2826_v3  ;;  %v1281_v26 = vand.u32 2147483648, %v2826_v3 }
 0x205   :  { %1635 = vst [vmem:[#allocation11 + $0x30] sm:$0xff] %v1623_v8  ;;  %v1398_v10 = vsel %vm1397_vm7, %v2188_v45, %v1394_v5  ;;  %v1305_v52 = vadd.f32 0.112945676, %v1304_v7  ;;  %vm1276_vm9 = vweird.f32 %v2190_v62  ;;  %v1503_v32 = vadd.f32 0.014752088, %v1502_v57 }
 0x206   :  { %v1403_v13 = vsel %vm2853_vm6, %v1402_v37, %v1398_v10  ;;  %v1273_v31 = vmul.f32 %v2190_v62, %v1272_v18  ;;  %v1294_v0 = vadd.f32 0.05243302, %v1293_v14  ;;  %v1493_v55 = vmul.f32 %v1492_v56, %v2819_v6  ;;  %vm1277_vm10 = vmor %vm1275_vm8, %vm1276_vm9 }
 0x207   :  { %v1404_v60 = vmul.f32 %v1403_v13, %v1379_v54  ;;  %v1306_v35 = vmul.f32 %v1305_v52, %v2813_v4  ;;  %v1529_v38 = vmul.f32 2.1237322e-06, %v2867_v44  ;;  %v1504_v25 = vmul.f32 %v1503_v32, %v2819_v6  ;;  %v2205_v13 = vld [vmem:[#allocation2 + $0x20] sm:$0xff] }
 0x208   :  { %v1274_v23 = vadd.f32 %v2190_v62, %v1273_v31  ;;  %v1540_v36 = vmul.f32 3.8918573e-05, %v2867_v44  ;;  %vm1280_vm11 = vcmp.eq.f32.partialorder %v1279_v43, 8.507059e+37  ;;  %v1282_v45 = vor.u32 1.1754944e-38, %v1281_v26 }
 0x209   :  { %v2055_v40 = vclamps-f32 %v1404_v60, 1.0  ;;  %v1307_v54 = vadd.f32 0.4994258, %v1306_v35  ;;  %v1530_v53 = vadd.f32 0.00028619796, %v1529_v38  ;;  %v1295_v30 = vmul.f32 %v1294_v0, %v2813_v4 }
 0x20a   :  { %v1278_v39 = vsel %vm1277_vm10, %v2190_v62, %v1274_v23  ;;  %v1505_v11 = vadd.f32 0.112945676, %v1504_v25  ;;  %v1541_v1 = vadd.f32 0.001143296, %v1540_v36  ;;  %v1494_v24 = vadd.f32 0.05243302, %v1493_v55 }
 0x20b   :  { %v1574_v48 = vadd.f32 1.0, %v2055_v40  ;;  %v1283_v49 = vsel %vm1280_vm11, %v1282_v45, %v1278_v39  ;;  %v1308_v29 = vmul.f32 %v1307_v54, %v2813_v4  ;;  %v1531_v9 = vmul.f32 %v1530_v53, %v2867_v44 }
 0x20c   :  { %v1284_v50 = vmul.f32 %v1283_v49, %v1259_v28  ;;  %v1506_v3 = vmul.f32 %v1505_v11, %v2819_v6  ;;  %v1542_v51 = vmul.f32 %v1541_v1, %v2867_v44  ;;  %v1067_v62 = vmul.f32 0.5, %v2715_v15 }
 0x20d   :  { %v1586_v20 = vmul.f32 %v1574_v48, %v2832_v47  ;;  %v1309_v42 = vadd.f32 1.0, %v1308_v29  ;;  %v1597_v63 = vperm.slane %v2550_v33, 4  ;;  %v1296_v37 = vadd.f32 0.18741608, %v1295_v30  ;;  %v2204_v47 = vld [vmem:[#allocation2 + $0x38] sm:$0xff] }
 0x20e   :  { %v2052_v58 = vclamps-f32 %v1284_v50, 1.0  ;;  %v1507_v61 = vadd.f32 0.4994258, %v1506_v3  ;;  %v1495_v59 = vmul.f32 %v1494_v24, %v2819_v6  ;;  %v1532_v5 = vadd.f32 0.0036580483, %v1531_v9 }
 0x20f   :  { %v1612_v41 = vmul.f32 %v1594_v21, %v1586_v20  ;;  %2191 = vrcp.f32 %v1309_v42  ;;  %v1543_v28 = vadd.f32 0.014752088, %v1542_v51  ;;  %v1297_v7 = vmul.f32 %v1296_v37, %v2813_v4 }
 0x210   :  { %v1571_v34 = vadd.f32 1.0, %v2052_v58  ;;  %v1508_v8 = vmul.f32 %v1507_v61, %v2819_v6  ;;  %v1496_v56 = vadd.f32 0.18741608, %v1495_v59  ;;  %v1533_v10 = vmul.f32 %v1532_v5, %v2867_v44 }
 0x211   :  { %v1624_v2 = vadd.f32 %v2204_v47, %v1612_v41  ;;  %v1544_v14 = vmul.f32 %v1543_v28, %v2867_v44  ;;  %v1298_v60 = vadd.f32 1.1283791, %v1297_v7  ;;  %v1321_v0 = vand.u32 2147483648, %v1309_v42 }
 0x212   :  { %v1583_v27 = vmul.f32 %v1571_v34, %v1067_v62  ;;  %v1509_v21 = vadd.f32 1.0, %v1508_v8  ;;  %v1497_v32 = vmul.f32 %v1496_v56, %v2819_v6  ;;  %v1534_v35 = vadd.f32 0.05243302, %v1533_v10 }
 0x213   :  { %1636 = vst [vmem:[#allocation11 + $0x38] sm:$0xff] %v1624_v2  ;;  %v1545_v18 = vadd.f32 0.112945676, %v1544_v14  ;;  %v1319_v40 = vand.u32 2147483647, %v1309_v42  ;;  %v1299_v36 = vmul.f32 %v1298_v60, %v2793_v46  ;;  %vm1315_vm13 = vweird.f32 %v1309_v42  ;;  %v2206_v14 = vld [vmem:[#allocation2 + $0x28] sm:$0xff] }
 0x214   :  { %v1609_v15 = vmul.f32 %v1597_v63, %v1583_v27  ;;  %2193 = vrcp.f32 %v1509_v21  ;;  %v1498_v54 = vadd.f32 1.1283791, %v1497_v32  ;;  %v1322_v53 = vor.u32 1.1754944e-38, %v1321_v0 }
 0x215   :  { %v2192_v57 = vpop.eup %2191  ;;  %v1546_v52 = vmul.f32 %v1545_v18, %v2867_v44  ;;  %v1535_v6 = vmul.f32 %v1534_v35, %v2867_v44  ;;  %vm1320_vm15 = vcmp.eq.f32.partialorder %v1319_v40, 8.507059e+37  ;;  %v1519_v1 = vand.u32 2147483647, %v1509_v21 }
 0x216   :  { %v1621_v43 = vadd.f32 %v2205_v13, %v1609_v15  ;;  %v1311_v26 = vmul.f32 %v2192_v57, %v1309_v42  ;;  %vm1316_vm12 = vweird.f32 %v2192_v57  ;;  %v1521_v49 = vand.u32 2147483648, %v1509_v21  ;;  %v2207_v13 = vld [vmem:[#allocation2 + $0x50] sm:$0xff] }
 0x217   :  { %v1547_v55 = vadd.f32 0.4994258, %v1546_v52  ;;  %vm1317_vm14 = vmor %vm1315_vm13, %vm1316_vm12  ;;  %vm1515_vm1 = vweird.f32 %v1509_v21  ;;  %v1536_v46 = vadd.f32 0.18741608, %v1535_v6  ;;  %v1499_v42 = vmul.f32 %v1498_v54, %v2797_v22 }
 0x218   :  { %1633 = vst [vmem:[#allocation11 + $0x20] sm:$0xff] %v1621_v43  ;;  %v1312_v31 = vsub.f32 1.0, %v1311_v26  ;;  %v1522_v3 = vor.u32 1.1754944e-38, %v1521_v49  ;;  %vm1520_vm3 = vcmp.eq.f32.partialorder %v1519_v1, 8.507059e+37  ;;  %v1068_v51 = vmul.f32 0.5, %v2767_v12 }
 0x219   :  { %v1548_v25 = vmul.f32 %v1547_v55, %v2867_v44  ;;  %v1598_v58 = vperm.slane %v2550_v33, 5  ;;  %v1537_v47 = vmul.f32 %v1536_v46, %v2867_v44  ;;  %v1073_v28 = vmul.f32 0.5, %v2781_v16 }
 0x21a   :  { %v2194_v4 = vpop.eup %2193  ;;  %v1313_v38 = vmul.f32 %v2192_v57, %v1312_v31  ;;  %v1074_v31 = vmul.f32 0.5, %v2838_v19 }
 0x21b   :  { %v1511_v23 = vmul.f32 %v2194_v4, %v1509_v21  ;;  %v1549_v39 = vadd.f32 1.0, %v1548_v25  ;;  %vm1516_vm0 = vweird.f32 %v2194_v4  ;;  %v1538_v27 = vadd.f32 1.1283791, %v1537_v47 }
 0x21c   :  { %v1314_v45 = vadd.f32 %v2192_v57, %v1313_v38  ;;  %vm1517_vm2 = vmor %vm1515_vm1, %vm1516_vm0 }
 0x21d   :  { %v1512_v48 = vsub.f32 1.0, %v1511_v23  ;;  %2195 = vrcp.f32 %v1549_v39  ;;  %v1561_v21 = vand.u32 2147483648, %v1549_v39  ;;  %v1559_v7 = vand.u32 2147483647, %v1549_v39 }
 0x21e   :  { %v1318_v11 = vsel %vm1317_vm14, %v2192_v57, %v1314_v45  ;;  %vm1555_vm5 = vweird.f32 %v1549_v39  ;;  %v1539_v18 = vmul.f32 %v1538_v27, %v2849_v17  ;;  %v2208_v17 = vld [vmem:[#allocation2 + $0x58] sm:$0xff] }
 0x21f   :  { %v1323_v30 = vsel %vm1320_vm15, %v1322_v53, %v1318_v11  ;;  %v1513_v29 = vmul.f32 %v2194_v4, %v1512_v48  ;;  %v1562_v10 = vor.u32 1.1754944e-38, %v1561_v21  ;;  %vm1560_vm7 = vcmp.eq.f32.partialorder %v1559_v7, 8.507059e+37 }
 0x220   :  { %v1324_v20 = vmul.f32 %v1323_v30, %v1299_v36 }
 0x221   :  { %v1514_v50 = vadd.f32 %v2194_v4, %v1513_v29 }
 0x222   :  { %v2053_v24 = vclamps-f32 %v1324_v20, 1.0 }
 0x223   :  { %v1518_v9 = vsel %vm1517_vm2, %v2194_v4, %v1514_v50  ;;  %v2196_v62 = vpop.eup %2195 }
 0x224   :  { %v1572_v41 = vadd.f32 1.0, %v2053_v24  ;;  %v1523_v61 = vsel %vm1520_vm3, %v1522_v3, %v1518_v9  ;;  %v1551_v34 = vmul.f32 %v2196_v62, %v1549_v39  ;;  %vm1556_vm4 = vweird.f32 %v2196_v62 }
 0x225   :  { %v1524_v37 = vmul.f32 %v1523_v61, %v1499_v42  ;;  %vm1557_vm6 = vmor %vm1555_vm5, %vm1556_vm4 }
 0x226   :  { %v1584_v2 = vmul.f32 %v1572_v41, %v1068_v51  ;;  %v1552_v5 = vsub.f32 1.0, %v1551_v34 }
 0x227   :  { %v2058_v59 = vclamps-f32 %v1524_v37, 1.0 }
 0x228   :  { %v1610_v8 = vmul.f32 %v1598_v58, %v1584_v2  ;;  %v1553_v15 = vmul.f32 %v2196_v62, %v1552_v5 }
 0x229   :  { %v1577_v22 = vadd.f32 1.0, %v2058_v59 }
 0x22a   :  { %v1622_v12 = vadd.f32 %v2206_v14, %v1610_v8  ;;  %v1554_v57 = vadd.f32 %v2196_v62, %v1553_v15 }
 0x22b   :  { %v1589_v56 = vmul.f32 %v1577_v22, %v1073_v28 }
 0x22c   :  { %1634 = vst [vmem:[#allocation11 + $0x28] sm:$0xff] %v1622_v12  ;;  %v1558_v16 = vsel %vm1557_vm6, %v2196_v62, %v1554_v57 }
 0x22d   :  { %v1615_v44 = vmul.f32 %v1597_v63, %v1589_v56  ;;  %v1563_v26 = vsel %vm1560_vm7, %v1562_v10, %v1558_v16 }
 0x22e   :  { %v1564_v52 = vmul.f32 %v1563_v26, %v1539_v18 }
 0x22f   :  { %v1627_v43 = vadd.f32 %v2207_v13, %v1615_v44 }
 0x230   :  { %v2059_v60 = vclamps-f32 %v1564_v52, 1.0 }
 0x231   :  { %1639 = vst [vmem:[#allocation11 + $0x50] sm:$0xff] %v1627_v43 }
 0x232   :  { %v1578_v32 = vadd.f32 1.0, %v2059_v60 }
 0x234   :  { %v1590_v0 = vmul.f32 %v1578_v32, %v1074_v31 }
 0x236   :  { %v1616_v33 = vmul.f32 %v1598_v58, %v1590_v0 }
 0x238   :  { %v1628_v63 = vadd.f32 %v2208_v17, %v1616_v33 }
 0x23a   :  { %1640 = vst [vmem:[#allocation11 + $0x58] sm:$0xff] %v1628_v63 }
 0x23b   :  { %1653 = dma.vmem_to_hbm [thread:$0]  %s1646_s25, 1536, %s1648_s28, [#allocation4], %s2366_s15, %s2366_s15, %s2367_s16  }
 0x23c   :  { %2359 = dma.done.wait [#allocation4], 1536  }
 0x23d   :  { %2360 = vsyncadd [#allocation4], 4294965760 }
 0x23e   :  { %1658 = vsyncpa [#allocation3], 1 }
 0x23f   :  { %1659 = vsyncpa [#allocation6], 1 }
 0x240   :  { %1660 = vsyncpa [#allocation9], 1 }
 0x241   :  { %1661 = vsyncpa [#allocation4], 1 }

</bundles_post_ra>
